<compile_context>
chip_gen: v6e
topology: v6e:2x2x1
jax: 0.10.0
libtpu: 0.0.40
codegen_flags: <defaults>
</compile_context>

<pallas_src>
import functools
import math

import jax
import jax.numpy as jnp
from jax.experimental import pallas as pl
from jax.experimental.pallas import tpu as pltpu

_LOG6 = math.log(6.0)


def _exp_acc(arg, exp_dtype):
    """exp() optionally evaluated in a narrower dtype, result returned in f32."""
    if exp_dtype == jnp.float32:
        return jnp.exp(arg)
    return jnp.exp(arg.astype(exp_dtype)).astype(jnp.float32)


def _arc_length_loss_kernel(x_ref, out_ref, *, inv_b, exp_dtype):
    """x_ref: [tb, 10, td] native-layout block.  out_ref: [1, td] f32 (resident)."""
    # INVARIANT: the batch-reduction axis `b` is the innermost (last) grid axis
    # and the output index_map ignores it, so this (1, td) output block stays
    # resident in VMEM across every batch tile of the current d tile.
    b = pl.program_id(1)

    @pl.when(b == 0)
    def _():
        out_ref[...] = jnp.zeros_like(out_ref)

    ld = lambda c: x_ref[:, c, :].astype(jnp.float32)

    # Base channels (needed for every partial arc-length sum and for diff_3).
    v_1_2 = ld(6)
    v_2_3 = ld(7)
    v_3_4 = ld(8)
    v_4_5 = ld(9)

    # diff_3: the 12 reference differences collapse exactly to
    # {-v_1_2, -v_2_3, -v_3_4, -v_4_5}, each appearing 3 times, so the mean of
    # the 12 exps is 0.25 * (exp(-v12)+exp(-v23)+exp(-v34)+exp(-v45)).
    # Sequential accumulation keeps at most one exp result live besides `d3`.
    d3 = _exp_acc(-v_1_2, exp_dtype)
    d3 = d3 + _exp_acc(-v_2_3, exp_dtype)
    d3 = d3 + _exp_acc(-v_3_4, exp_dtype)
    d3 = d3 + _exp_acc(-v_4_5, exp_dtype)
    total = 0.25 * d3

    # v16 = log(mean over 6 of exp(| |a| - |b| |)) == log(sum_exp) - log(6).
    # Each term's channel is loaded immediately before use and the term is
    # folded into a running sum so its operands die right away.
    def term(a, s):
        return _exp_acc(jnp.abs(jnp.abs(a) - jnp.abs(s)), exp_dtype)

    v_1_3_sum = v_1_2 + v_2_3
    se = term(ld(0), v_1_3_sum)               # v_1_3
    v_2_4_sum = v_2_3 + v_3_4
    se = se + term(ld(1), v_2_4_sum)          # v_2_4
    v_3_5_sum = v_3_4 + v_4_5
    se = se + term(ld(2), v_3_5_sum)          # v_3_5
    v_1_4_sum = v_1_3_sum + v_3_4
    se = se + term(ld(3), v_1_4_sum)          # v_1_4
    v_2_5_sum = v_2_4_sum + v_4_5
    se = se + term(ld(4), v_2_5_sum)          # v_2_5
    v_1_5_sum = v_1_4_sum + v_4_5
    se = se + term(ld(5), v_1_5_sum)          # v_1_5

    total = total + (jnp.log(se) - _LOG6)     # per-element v16 + diff_3

    # Accumulate the batch-tile partial sum directly into the resident output.
    out_ref[...] += jnp.sum(total, axis=0, keepdims=True)

    @pl.when(b == pl.num_programs(1) - 1)
    def _():
        out_ref[...] = out_ref[...] * inv_b


def _pick_td(D):
    # Prefer lane-dense tiles with >= 2 blocks along D (v7x megacore), then
    # any lane-dense divisor, then the full extent as a legality fallback.
    for cand in (512, 384, 256, 128):
        if D % cand == 0 and D // cand >= 2:
            return cand
    for cand in (512, 384, 256, 128):
        if D % cand == 0:
            return cand
    return D


def _pick_tb(B):
    for cand in (256, 128, 64, 32, 16, 8):
        if B % cand == 0:
            return cand
    return B


def arc_length_loss(output, *, tb=None, td=None, use_bf16_exp=False):
    """output: [B, 10, D] -> loss of shape [D] (mean over channels and batch),
    matching PyTorch ArcLengthLoss.forward (v16.mean(0) + diff_3.mean(0)).
    `use_bf16_exp=True` runs the exp() calls in bf16 (v6e/v7x EUP win; keep
    False on v5e / when full f32 accuracy is required)."""
    B, C, D = output.shape
    assert C == 10, "ArcLengthLoss expects 10 channels in dim 1"

    if td is None:
        td = _pick_td(D)
    if tb is None:
        tb = _pick_tb(B)
    assert B % tb == 0 and D % td == 0, (B, tb, D, td)

    # Grid: D tiles are independent ("parallel", megacore-shardable on v7x);
    # B tiles are the reduction and MUST be the innermost ("arbitrary") axis so
    # the resident output block accumulates correctly.
    grid = (D // td, B // tb)
    inv_b = 1.0 / float(B)
    exp_dtype = jnp.bfloat16 if use_bf16_exp else jnp.float32

    kernel = functools.partial(_arc_length_loss_kernel,
                               inv_b=inv_b, exp_dtype=exp_dtype)

    # Advisory cost hint: 10 exps + 1 log per (B*D) element.
    cost = pl.CostEstimate(
        flops=int(40 * B * D),
        transcendentals=int(11 * B * D),
        bytes_accessed=int(B * C * D * output.dtype.itemsize + D * 4),
    )

    # VMEM budget: double-buffered input block with the channel (sublane) dim
    # padded 10 -> 16, plus an allowance (~16 live f32 [tb, td] arrays) for
    # Mosaic's elementwise temporaries; capped at 48 MiB so it fits v7x's
    # 64 MiB physical VMEM with headroom.
    c_pad = 16
    in_block = tb * c_pad * td * output.dtype.itemsize
    temps = 16 * tb * td * 4
    vmem_limit = min(2 * in_block + temps + (2 << 20), 48 << 20)
    vmem_limit = max(vmem_limit, 4 << 20)

    res = pl.pallas_call(
        kernel,
        out_shape=jax.ShapeDtypeStruct((1, D), jnp.float32),
        grid_spec=pltpu.PrefetchScalarGridSpec(
            num_scalar_prefetch=0,
            grid=grid,
            in_specs=[pl.BlockSpec((tb, C, td), lambda d, b: (b, 0, d))],
            out_specs=pl.BlockSpec((1, td), lambda d, b: (0, d)),
        ),
        compiler_params=pltpu.CompilerParams(
            dimension_semantics=("parallel", "arbitrary"),
            vmem_limit_bytes=int(vmem_limit),
        ),
        cost_estimate=cost,
    )(output)
    return res[0]


def _reference(output):
    """Pure-JAX transcription of the original PyTorch forward (unsimplified)."""
    x = output
    (v_1_3, v_2_4, v_3_5, v_1_4, v_2_5, v_1_5,
     v_1_2, v_2_3, v_3_4, v_4_5) = [x[:, i, :] for i in range(10)]
    v_1_3_sum = v_1_2 + v_2_3
    v_2_4_sum = v_2_3 + v_3_4
    v_3_5_sum = v_3_4 + v_4_5
    v_1_4_sum = v_1_2 + v_2_3 + v_3_4
    v_2_5_sum = v_2_3 + v_3_4 + v_4_5
    v_1_5_sum = v_1_2 + v_2_3 + v_3_4 + v_4_5
    diff = jnp.stack([
        v_2_5_sum - v_1_5_sum, v_1_4_sum - v_1_5_sum, v_3_5_sum - v_2_5_sum,
        v_2_4_sum - v_2_5_sum, v_2_4_sum - v_1_4_sum, v_1_3_sum - v_1_4_sum,
        v_1_2 - v_1_3_sum, v_2_3 - v_1_3_sum, v_2_3 - v_2_4_sum,
        v_3_4 - v_2_4_sum, v_3_4 - v_3_5_sum, v_4_5 - v_3_5_sum], axis=1)
    v10 = jnp.abs(jnp.stack([
        v_1_3, v_1_3_sum, v_2_4, v_2_4_sum, v_3_5, v_3_5_sum,
        v_1_4, v_1_4_sum, v_2_5, v_2_5_sum, v_1_5, v_1_5_sum], axis=1))
    v13 = jnp.abs(v10[:, 0::2, :] - v10[:, 1::2, :])
    v16 = jnp.log(jnp.mean(jnp.exp(v13), axis=1))
    diff_3 = jnp.mean(jnp.exp(diff), axis=1)
    return jnp.mean(v16, axis=0) + jnp.mean(diff_3, axis=0)


if __name__ == "__main__":
    key = jax.random.PRNGKey(0)
    # Small but tiling-friendly shapes: 1 batch tile x 2 feature tiles.
    B, C, D = 16, 10, 256
    output = jax.random.normal(key, (B, C, D), dtype=jnp.float32) * 0.5

    loss = jax.block_until_ready(arc_length_loss(output))
    ref = jax.block_until_ready(_reference(output))

    assert loss.shape == (D,), loss.shape
    assert jnp.allclose(loss, ref, atol=1e-5, rtol=1e-5), (loss, ref)
    print("KERNEL_OK")
</pallas_src>

<mosaic_0001>
module attributes {stable_mosaic.version = 11 : i64} {
  func.func @_arc_length_loss_kernel(%arg0: i32, %arg1: i32, %arg2: memref<16x10x128xf32, #tpu.memory_space<vmem>>, %arg3: memref<1x128xf32, #tpu.memory_space<vmem>>) attributes {dimension_semantics = [#tpu.dimension_semantics<parallel>, #tpu.dimension_semantics<arbitrary>], iteration_bounds = array<i64: 2, 1>, scalar_prefetch = 0 : i64, scratch_operands = 0 : i64, tpu.core_type = #tpu.core_type<tc>, window_params = [{transform_indices = @transform_0, window_bounds = array<i64: 16, 10, 128>}, {transform_indices = @transform_1, window_bounds = array<i64: 1, 128>}]} {
    %c0_i32 = arith.constant 0 : i32
    %0 = arith.cmpi eq, %arg1, %c0_i32 : i32
    %1 = arith.extui %0 : i1 to i32
    %c0_i32_0 = arith.constant 0 : i32
    %2 = arith.cmpi ne, %1, %c0_i32_0 : i32
    scf.if %2 {
      %cst_33 = arith.constant 0.000000e+00 : f32
      %93 = vector.broadcast %cst_33 : f32 to vector<1x128xf32>
      %c0_34 = arith.constant 0 : index
      %c0_35 = arith.constant 0 : index
      %94 = vector.load %arg3[%c0_34, %c0_35] : memref<1x128xf32, #tpu.memory_space<vmem>>, vector<1x128xf32>
      tpu.vector_store %arg3[%c0_34, %c0_35], %93 {strides = array<i32>} : memref<1x128xf32, #tpu.memory_space<vmem>>, vector<1x128xf32>,
    } else {
    }
    %c0 = arith.constant 0 : index
    %c6 = arith.constant 6 : index
    %c0_1 = arith.constant 0 : index
    %3 = vector.load %arg2[%c0, %c6, %c0_1] : memref<16x10x128xf32, #tpu.memory_space<vmem>>, vector<16x1x128xf32>
    %4 = vector.shape_cast %3 : vector<16x1x128xf32> to vector<16x128xf32>
    %c0_2 = arith.constant 0 : index
    %c7 = arith.constant 7 : index
    %c0_3 = arith.constant 0 : index
    %5 = vector.load %arg2[%c0_2, %c7, %c0_3] : memref<16x10x128xf32, #tpu.memory_space<vmem>>, vector<16x1x128xf32>
    %6 = vector.shape_cast %5 : vector<16x1x128xf32> to vector<16x128xf32>
    %c0_4 = arith.constant 0 : index
    %c8 = arith.constant 8 : index
    %c0_5 = arith.constant 0 : index
    %7 = vector.load %arg2[%c0_4, %c8, %c0_5] : memref<16x10x128xf32, #tpu.memory_space<vmem>>, vector<16x1x128xf32>
    %8 = vector.shape_cast %7 : vector<16x1x128xf32> to vector<16x128xf32>
    %c0_6 = arith.constant 0 : index
    %c9 = arith.constant 9 : index
    %c0_7 = arith.constant 0 : index
    %9 = vector.load %arg2[%c0_6, %c9, %c0_7] : memref<16x10x128xf32, #tpu.memory_space<vmem>>, vector<16x1x128xf32>
    %10 = vector.shape_cast %9 : vector<16x1x128xf32> to vector<16x128xf32>
    %cst = arith.constant 0.000000e+00 : f32
    %11 = vector.broadcast %cst : f32 to vector<16x128xf32>
    %12 = arith.subf %11, %4 : vector<16x128xf32>
    %13 = math.exp %12 : vector<16x128xf32>
    %cst_8 = arith.constant 0.000000e+00 : f32
    %14 = vector.broadcast %cst_8 : f32 to vector<16x128xf32>
    %15 = arith.subf %14, %6 : vector<16x128xf32>
    %16 = math.exp %15 : vector<16x128xf32>
    %17 = arith.addf %13, %16 : vector<16x128xf32>
    %cst_9 = arith.constant 0.000000e+00 : f32
    %18 = vector.broadcast %cst_9 : f32 to vector<16x128xf32>
    %19 = arith.subf %18, %8 : vector<16x128xf32>
    %20 = math.exp %19 : vector<16x128xf32>
    %21 = arith.addf %17, %20 : vector<16x128xf32>
    %cst_10 = arith.constant 0.000000e+00 : f32
    %22 = vector.broadcast %cst_10 : f32 to vector<16x128xf32>
    %23 = arith.subf %22, %10 : vector<16x128xf32>
    %24 = math.exp %23 : vector<16x128xf32>
    %25 = arith.addf %21, %24 : vector<16x128xf32>
    %cst_11 = arith.constant 2.500000e-01 : f32
    %26 = vector.broadcast %cst_11 : f32 to vector<16x128xf32>
    %27 = arith.mulf %26, %25 : vector<16x128xf32>
    %28 = arith.addf %4, %6 : vector<16x128xf32>
    %c0_12 = arith.constant 0 : index
    %c0_13 = arith.constant 0 : index
    %c0_14 = arith.constant 0 : index
    %29 = vector.load %arg2[%c0_12, %c0_13, %c0_14] : memref<16x10x128xf32, #tpu.memory_space<vmem>>, vector<16x1x128xf32>
    %30 = vector.shape_cast %29 : vector<16x1x128xf32> to vector<16x128xf32>
    %31 = math.absf %30 : vector<16x128xf32>
    %32 = math.absf %28 : vector<16x128xf32>
    %33 = arith.subf %31, %32 : vector<16x128xf32>
    %34 = math.absf %33 : vector<16x128xf32>
    %35 = math.exp %34 : vector<16x128xf32>
    %36 = arith.addf %6, %8 : vector<16x128xf32>
    %c0_15 = arith.constant 0 : index
    %c1 = arith.constant 1 : index
    %c0_16 = arith.constant 0 : index
    %37 = vector.load %arg2[%c0_15, %c1, %c0_16] : memref<16x10x128xf32, #tpu.memory_space<vmem>>, vector<16x1x128xf32>
    %38 = vector.shape_cast %37 : vector<16x1x128xf32> to vector<16x128xf32>
    %39 = math.absf %38 : vector<16x128xf32>
    %40 = math.absf %36 : vector<16x128xf32>
    %41 = arith.subf %39, %40 : vector<16x128xf32>
    %42 = math.absf %41 : vector<16x128xf32>
    %43 = math.exp %42 : vector<16x128xf32>
    %44 = arith.addf %35, %43 : vector<16x128xf32>
    %45 = arith.addf %8, %10 : vector<16x128xf32>
    %c0_17 = arith.constant 0 : index
    %c2 = arith.constant 2 : index
    %c0_18 = arith.constant 0 : index
    %46 = vector.load %arg2[%c0_17, %c2, %c0_18] : memref<16x10x128xf32, #tpu.memory_space<vmem>>, vector<16x1x128xf32>
    %47 = vector.shape_cast %46 : vector<16x1x128xf32> to vector<16x128xf32>
    %48 = math.absf %47 : vector<16x128xf32>
    %49 = math.absf %45 : vector<16x128xf32>
    %50 = arith.subf %48, %49 : vector<16x128xf32>
    %51 = math.absf %50 : vector<16x128xf32>
    %52 = math.exp %51 : vector<16x128xf32>
    %53 = arith.addf %44, %52 : vector<16x128xf32>
    %54 = arith.addf %28, %8 : vector<16x128xf32>
    %c0_19 = arith.constant 0 : index
    %c3 = arith.constant 3 : index
    %c0_20 = arith.constant 0 : index
    %55 = vector.load %arg2[%c0_19, %c3, %c0_20] : memref<16x10x128xf32, #tpu.memory_space<vmem>>, vector<16x1x128xf32>
    %56 = vector.shape_cast %55 : vector<16x1x128xf32> to vector<16x128xf32>
    %57 = math.absf %56 : vector<16x128xf32>
    %58 = math.absf %54 : vector<16x128xf32>
    %59 = arith.subf %57, %58 : vector<16x128xf32>
    %60 = math.absf %59 : vector<16x128xf32>
    %61 = math.exp %60 : vector<16x128xf32>
    %62 = arith.addf %53, %61 : vector<16x128xf32>
    %63 = arith.addf %36, %10 : vector<16x128xf32>
    %c0_21 = arith.constant 0 : index
    %c4 = arith.constant 4 : index
    %c0_22 = arith.constant 0 : index
    %64 = vector.load %arg2[%c0_21, %c4, %c0_22] : memref<16x10x128xf32, #tpu.memory_space<vmem>>, vector<16x1x128xf32>
    %65 = vector.shape_cast %64 : vector<16x1x128xf32> to vector<16x128xf32>
    %66 = math.absf %65 : vector<16x128xf32>
    %67 = math.absf %63 : vector<16x128xf32>
    %68 = arith.subf %66, %67 : vector<16x128xf32>
    %69 = math.absf %68 : vector<16x128xf32>
    %70 = math.exp %69 : vector<16x128xf32>
    %71 = arith.addf %62, %70 : vector<16x128xf32>
    %72 = arith.addf %54, %10 : vector<16x128xf32>
    %c0_23 = arith.constant 0 : index
    %c5 = arith.constant 5 : index
    %c0_24 = arith.constant 0 : index
    %73 = vector.load %arg2[%c0_23, %c5, %c0_24] : memref<16x10x128xf32, #tpu.memory_space<vmem>>, vector<16x1x128xf32>
    %74 = vector.shape_cast %73 : vector<16x1x128xf32> to vector<16x128xf32>
    %75 = math.absf %74 : vector<16x128xf32>
    %76 = math.absf %72 : vector<16x128xf32>
    %77 = arith.subf %75, %76 : vector<16x128xf32>
    %78 = math.absf %77 : vector<16x128xf32>
    %79 = math.exp %78 : vector<16x128xf32>
    %80 = arith.addf %71, %79 : vector<16x128xf32>
    %81 = math.log %80 : vector<16x128xf32>
    %cst_25 = arith.constant 1.79175949 : f32
    %82 = vector.broadcast %cst_25 : f32 to vector<16x128xf32>
    %83 = arith.subf %81, %82 : vector<16x128xf32>
    %84 = arith.addf %27, %83 : vector<16x128xf32>
    %c0_26 = arith.constant 0 : index
    %c0_27 = arith.constant 0 : index
    %85 = vector.load %arg3[%c0_26, %c0_27] : memref<1x128xf32, #tpu.memory_space<vmem>>, vector<1x128xf32>
    %cst_28 = arith.constant dense<0.000000e+00> : vector<128xf32>
    %86 = vector.multi_reduction <add>, %84, %cst_28 [0] : vector<16x128xf32> to vector<128xf32>
    %87 = vector.shape_cast %86 : vector<128xf32> to vector<1x128xf32>
    %88 = arith.addf %85, %87 : vector<1x128xf32>
    %c0_29 = arith.constant 0 : index
    %c0_30 = arith.constant 0 : index
    %89 = vector.load %arg3[%c0_29, %c0_30] : memref<1x128xf32, #tpu.memory_space<vmem>>, vector<1x128xf32>
    tpu.vector_store %arg3[%c0_29, %c0_30], %88 {strides = array<i32>} : memref<1x128xf32, #tpu.memory_space<vmem>>, vector<1x128xf32>,
    %c0_i32_31 = arith.constant 0 : i32
    %90 = arith.cmpi eq, %arg1, %c0_i32_31 : i32
    %91 = arith.extui %90 : i1 to i32
    %c0_i32_32 = arith.constant 0 : i32
    %92 = arith.cmpi ne, %91, %c0_i32_32 : i32
    scf.if %92 {
      %c0_33 = arith.constant 0 : index
      %c0_34 = arith.constant 0 : index
      %93 = vector.load %arg3[%c0_33, %c0_34] : memref<1x128xf32, #tpu.memory_space<vmem>>, vector<1x128xf32>
      %cst_35 = arith.constant 6.250000e-02 : f32
      %94 = vector.broadcast %cst_35 : f32 to vector<1x128xf32>
      %95 = arith.mulf %93, %94 : vector<1x128xf32>
      %c0_36 = arith.constant 0 : index
      %c0_37 = arith.constant 0 : index
      %96 = vector.load %arg3[%c0_36, %c0_37] : memref<1x128xf32, #tpu.memory_space<vmem>>, vector<1x128xf32>
      tpu.vector_store %arg3[%c0_36, %c0_37], %95 {strides = array<i32>} : memref<1x128xf32, #tpu.memory_space<vmem>>, vector<1x128xf32>,
    } else {
    }
    return
  }
  func.func @transform_0(%arg0: i32, %arg1: i32) -> (i32, i32, i32) {
    %c0_i32 = arith.constant 0 : i32
    %c0_i32_0 = arith.constant 0 : i32
    return %arg1, %c0_i32, %arg0 : i32, i32, i32
  }
  func.func @transform_1(%arg0: i32, %arg1: i32) -> (i32, i32) {
    %c0_i32 = arith.constant 0 : i32
    %c0_i32_0 = arith.constant 0 : i32
    return %c0_i32, %arg0 : i32, i32
  }
}

</mosaic_0001>

<bundles_post_ra>
// kernel: tpu_custom_call.1
= control target key start
LH: loop header
LB: loop body
LE: loop exit
PB: predicated region body
PF: predicated region fallthrough
CT: control target
= control target key end

     0   :  { %6 = vsyncpa [#allocation4], 0  ;;  %s4227_s0 = inlined_call_operand.vmem [shape: f32[16,10,256], index: 0, kind: input, shape index: {}]   ;;  %s4228_s1 = inlined_call_operand.hbm [shape: f32[1,256], index: 1, kind: output, shape index: {}]  }
   0x1   :  { %8 = vsyncpa [#allocation4 + $0x1], 0  ;;  %s2238_s6 = smov 0   ;;  %s2240_s7 = smov 0  }
   0x2   :  { %s2242_s8 = smov 0   ;;  %s2244_s9 = smov 0  }
   0x3   :  { %s2246_s10 = smov 0   ;;  %s2248_s11 = smov 0  }
   0x4 LB: > { %s1681_s12 = sadd.s32 4294967295, %s2224_s11   ;;  %s1682_s13 = sadd.s32 4294967294, %s2224_s11   ;;  %s2224_s11 = sphi %s2248_s11, %s14_s11   ;;  %s2220_s10 = sphi %s2246_s10, %s4630_s10   ;;  %s2216_s9 = sphi %s2244_s9, %s4629_s9   ;;  %s2212_s8 = sphi %s2242_s8, %s4628_s8   ;;  %s2208_s7 = sphi %s2240_s7, %s4627_s7   ;;  %s2204_s6 = sphi %s2238_s6, %s4626_s6  }
   0x5   : > { %s26_s14 = sadd.s32 1, %s2220_s10  ;;  %s35_s15 = sadd.s32 1, %s2212_s8 }
   0x6   : > { %p28_p0 = scmp.ge.s32.totalorder %s26_s14, 2  ;;  %p42_p1 = scmp.ne.s32.totalorder %s2212_s8, %s2208_s7 }
   0x7   : > { %p43_p2 = scmp.eq.s32.totalorder %s2224_s11, 0  ;;  %p72_p3 = scmp.eq.s32.totalorder %s1681_s12, 1 }
   0x8   : > { %s4632_s14 = smov (%p28_p0, %s26_s14), 0  ;;  %p77_p6 = scmp.ne.s32.totalorder %s2208_s7, %s2204_s6 }
   0x9   : > { %p44_p4 = por %p43_p2, %p42_p1  ;;  %p2277_p5 = por %p72_p3, %p42_p1 }
   0xa   : > { %s31_s17 = ssub.s32 %s2220_s10, %s4632_s14  ;;  %p78_p8 = scmp.eq.s32.totalorder %s1682_s13, 1 }
   0xb   : > { %p33_p7 = scmp.eq.s32.totalorder %s31_s17, 0  ;;  %p4296_p10 = scmp.ge.s32.totalorder %s2224_s11, 2 }
   0xc   : > { %p2288_p9 = por %p78_p8, %p77_p6 }
   0xd   : > { %s2286_s18 = scalar_select %p33_p7, %s2212_s8, %s35_s15  }
   0xe   : > { %94 = sbr.rel (%p4296_p10) target bundleno = 39 (0x27), region = 16 }
  0x13   : > { %97 = sbr.rel (!%p44_p4) target bundleno = 39 (0x27), region = 20  ;;  %s99_s20 = sand.u32 (%p44_p4), 1, %s2212_s8  }
  0x14   : > { %s1686_s21 = sshll.u32 (%p44_p4), %s2220_s10, 3  ;;  %s1685_s22 = sshll.u32 (%p44_p4), %s99_s20, 8 }
  0x15   : > { %s2300_s25 = scalar_lea.vmem (%p44_p4), %s4227_s0, %s1686_s21  ;;  %s2305_s26 = scalar_lea.vmem (%p44_p4), [#allocation2], %s1685_s22 }
  0x16   : > { %v197_v0 = vld [vmem:[%s2300_s25] sm:$0xff] (%p44_p4)  ;;  %v199_v1 = vld [vmem:[%s2300_s25 + $0x10] sm:$0xff] (%p44_p4) }
  0x17   : > { %v201_v2 = vld [vmem:[%s2300_s25 + $0x20] sm:$0xff] (%p44_p4)  ;;  %198 = vst [vmem:[%s2305_s26] sm:$0xff] (%p44_p4), %v197_v0  ;;  %200 = vst [vmem:[%s2305_s26 + $0x8] sm:$0xff] (%p44_p4), %v199_v1  ;;  %v203_v3 = vld [vmem:[%s2300_s25 + $0x30] sm:$0xff] (%p44_p4) }
  0x18   : > { %202 = vst [vmem:[%s2305_s26 + $0x10] sm:$0xff] %v201_v2  ;;  %v205_v4 = vld [vmem:[%s2300_s25 + $0x40] sm:$0xff]  ;;  %v207_v5 = vld [vmem:[%s2300_s25 + $0x50] sm:$0xff]  ;;  %204 = vst [vmem:[%s2305_s26 + $0x18] sm:$0xff] %v203_v3 }
  0x19   : > { %206 = vst [vmem:[%s2305_s26 + $0x20] sm:$0xff] %v205_v4  ;;  %208 = vst [vmem:[%s2305_s26 + $0x28] sm:$0xff] %v207_v5  ;;  %v209_v6 = vld [vmem:[%s2300_s25 + $0x60] sm:$0xff]  ;;  %v211_v7 = vld [vmem:[%s2300_s25 + $0x70] sm:$0xff] }
  0x1a   : > { %v213_v8 = vld [vmem:[%s2300_s25 + $0x80] sm:$0xff]  ;;  %210 = vst [vmem:[%s2305_s26 + $0x30] sm:$0xff] %v209_v6  ;;  %212 = vst [vmem:[%s2305_s26 + $0x38] sm:$0xff] %v211_v7  ;;  %v215_v9 = vld [vmem:[%s2300_s25 + $0x90] sm:$0xff] }
  0x1b   : > { %214 = vst [vmem:[%s2305_s26 + $0x40] sm:$0xff] %v213_v8  ;;  %v217_v10 = vld [vmem:[%s2300_s25 + $0xa0] sm:$0xff]  ;;  %v219_v11 = vld [vmem:[%s2300_s25 + $0xb0] sm:$0xff]  ;;  %216 = vst [vmem:[%s2305_s26 + $0x48] sm:$0xff] %v215_v9 }
  0x1c   : > { %218 = vst [vmem:[%s2305_s26 + $0x50] sm:$0xff] %v217_v10  ;;  %220 = vst [vmem:[%s2305_s26 + $0x58] sm:$0xff] %v219_v11  ;;  %v221_v12 = vld [vmem:[%s2300_s25 + $0xc0] sm:$0xff]  ;;  %v223_v13 = vld [vmem:[%s2300_s25 + $0xd0] sm:$0xff] }
  0x1d   : > { %v225_v14 = vld [vmem:[%s2300_s25 + $0xe0] sm:$0xff]  ;;  %222 = vst [vmem:[%s2305_s26 + $0x60] sm:$0xff] %v221_v12  ;;  %224 = vst [vmem:[%s2305_s26 + $0x68] sm:$0xff] %v223_v13  ;;  %v227_v15 = vld [vmem:[%s2300_s25 + $0xf0] sm:$0xff] }
  0x1e   : > { %226 = vst [vmem:[%s2305_s26 + $0x70] sm:$0xff] %v225_v14  ;;  %v229_v16 = vld [vmem:[%s2300_s25 + $0x100] sm:$0xff]  ;;  %v231_v17 = vld [vmem:[%s2300_s25 + $0x110] sm:$0xff]  ;;  %228 = vst [vmem:[%s2305_s26 + $0x78] sm:$0xff] %v227_v15 }
  0x1f   : > { %230 = vst [vmem:[%s2305_s26 + $0x80] sm:$0xff] %v229_v16  ;;  %232 = vst [vmem:[%s2305_s26 + $0x88] sm:$0xff] %v231_v17  ;;  %v233_v18 = vld [vmem:[%s2300_s25 + $0x120] sm:$0xff]  ;;  %v235_v19 = vld [vmem:[%s2300_s25 + $0x130] sm:$0xff] }
  0x20   : > { %v237_v20 = vld [vmem:[%s2300_s25 + $0x140] sm:$0xff]  ;;  %234 = vst [vmem:[%s2305_s26 + $0x90] sm:$0xff] %v233_v18  ;;  %236 = vst [vmem:[%s2305_s26 + $0x98] sm:$0xff] %v235_v19  ;;  %v239_v21 = vld [vmem:[%s2300_s25 + $0x150] sm:$0xff] }
  0x21   : > { %238 = vst [vmem:[%s2305_s26 + $0xa0] sm:$0xff] %v237_v20  ;;  %v241_v22 = vld [vmem:[%s2300_s25 + $0x160] sm:$0xff]  ;;  %v243_v23 = vld [vmem:[%s2300_s25 + $0x170] sm:$0xff]  ;;  %240 = vst [vmem:[%s2305_s26 + $0xa8] sm:$0xff] %v239_v21 }
  0x22   : > { %242 = vst [vmem:[%s2305_s26 + $0xb0] sm:$0xff] %v241_v22  ;;  %244 = vst [vmem:[%s2305_s26 + $0xb8] sm:$0xff] %v243_v23  ;;  %v245_v24 = vld [vmem:[%s2300_s25 + $0x180] sm:$0xff]  ;;  %v247_v25 = vld [vmem:[%s2300_s25 + $0x190] sm:$0xff] }
  0x23   : > { %v249_v26 = vld [vmem:[%s2300_s25 + $0x1a0] sm:$0xff]  ;;  %246 = vst [vmem:[%s2305_s26 + $0xc0] sm:$0xff] %v245_v24  ;;  %248 = vst [vmem:[%s2305_s26 + $0xc8] sm:$0xff] %v247_v25  ;;  %v251_v27 = vld [vmem:[%s2300_s25 + $0x1b0] sm:$0xff] }
  0x24   : > { %250 = vst [vmem:[%s2305_s26 + $0xd0] sm:$0xff] %v249_v26  ;;  %v253_v28 = vld [vmem:[%s2300_s25 + $0x1c0] sm:$0xff]  ;;  %v255_v29 = vld [vmem:[%s2300_s25 + $0x1d0] sm:$0xff]  ;;  %252 = vst [vmem:[%s2305_s26 + $0xd8] sm:$0xff] %v251_v27 }
  0x25   : > { %254 = vst [vmem:[%s2305_s26 + $0xe0] sm:$0xff] %v253_v28  ;;  %256 = vst [vmem:[%s2305_s26 + $0xe8] sm:$0xff] %v255_v29  ;;  %v257_v30 = vld [vmem:[%s2300_s25 + $0x1e0] sm:$0xff]  ;;  %v259_v31 = vld [vmem:[%s2300_s25 + $0x1f0] sm:$0xff] }
  0x26   : > { %258 = vst [vmem:[%s2305_s26 + $0xf0] sm:$0xff] %v257_v30  ;;  %260 = vst [vmem:[%s2305_s26 + $0xf8] sm:$0xff] %v259_v31 }
  0x27 PF: > { %p1687_p11 = scmp.ge.s32.totalorder %s2224_s11, 1  ;;  %p265_p12 = scmp.lt.s32.totalorder %s2224_s11, 3 }
  0x29   : > { %p266_p13 = pnand %p1687_p11, %p265_p12 }
  0x2b   : > { %269 = sbr.rel (%p266_p13) target bundleno = 426 (0x1aa), region = 58 }
  0x30   : > { %s2371_s27 = sand.u32 1, %s2208_s7   ;;  %v2226_v32 = vmov 0.0   ;;  %vm1546_vm0 = vcmask 1041409   ;;  %vm1549_vm1 = vcmask 1042434   ;;  %vm1552_vm2 = vcmask 1043459   ;;  %s1705_s2 = sshll.u32 %s2216_s9, 4 }
  0x31   : > { %s2374_s28 = scalar_lea.vmem [#allocation3], %s2371_s27  ;;  %s1688_s29 = sshll.u32 %s2371_s27, 8  ;;  %vm1555_vm3 = vcmask 1044484   ;;  %vm1558_vm4 = vcmask 1045509   ;;  %vm1561_vm5 = vcmask 1046534   ;;  %vm1564_vm6 = vcmask 1047559  }
  0x32   : > { %295 = vst [vmem:[%s2374_s28] sm:$0x1] %v2226_v32  ;;  %s2378_s30 = scalar_lea.vmem [#allocation2], %s1688_s29  ;;  %s1610_s3 = sshll.u32 %s2374_s28, 4  ;;  %s1611_s3 = int_to_ptr.vmem [resolvable:$true] %s1610_s3 }
  0x33   : > { %v2381_v33 = vld [vmem:[%s2378_s30 + $0x6] sm:$0x1]  ;;  %v2384_v34 = vld [vmem:[%s2378_s30 + $0x16] sm:$0x1]  ;;  %v2393_v37 = vld [vmem:[%s2378_s30 + $0x7] sm:$0x1]  ;;  %s1608_s12 = scalar_lea.hbm %s4228_s1, %s1705_s2 }
  0x34   : > { %v2387_v35 = vld [vmem:[%s2378_s30 + $0x26] sm:$0x1]  ;;  %v2390_v36 = vld [vmem:[%s2378_s30 + $0x36] sm:$0x1]  ;;  %v2396_v38 = vld [vmem:[%s2378_s30 + $0x17] sm:$0x1]  ;;  %v2487_v4 = vadd.f32 %v2393_v37, %v2381_v33 }
  0x35   : > { %v2399_v39 = vld [vmem:[%s2378_s30 + $0x27] sm:$0x1]  ;;  %v2402_v40 = vld [vmem:[%s2378_s30 + $0x37] sm:$0x1]  ;;  %v2405_v41 = vld [vmem:[%s2378_s30 + $0x46] sm:$0x1]  ;;  %v2491_v5 = vadd.f32 %v2396_v38, %v2384_v34 }
  0x36   : > { %v2408_v42 = vld [vmem:[%s2378_s30 + $0x56] sm:$0x1]  ;;  %v2411_v43 = vld [vmem:[%s2378_s30 + $0x66] sm:$0x1]  ;;  %v2417_v45 = vld [vmem:[%s2378_s30 + $0x47] sm:$0x1]  ;;  %v2495_v6 = vadd.f32 %v2399_v39, %v2387_v35  ;;  %v2499_v7 = vadd.f32 %v2402_v40, %v2390_v36 }
  0x37   : > { %v2414_v44 = vld [vmem:[%s2378_s30 + $0x76] sm:$0x1]  ;;  %v2420_v46 = vld [vmem:[%s2378_s30 + $0x57] sm:$0x1]  ;;  %v2423_v47 = vld [vmem:[%s2378_s30 + $0x67] sm:$0x1]  ;;  %v2512_v11 = vadd.f32 %v2417_v45, %v2405_v41 }
  0x38   : > { %v2426_v48 = vld [vmem:[%s2378_s30 + $0x86] sm:$0x1]  ;;  %v2429_v49 = vld [vmem:[%s2378_s30 + $0x96] sm:$0x1]  ;;  %v2438_v52 = vld [vmem:[%s2378_s30 + $0x77] sm:$0x1]  ;;  %v2516_v12 = vadd.f32 %v2420_v46, %v2408_v42  ;;  %v2520_v13 = vadd.f32 %v2423_v47, %v2411_v43 }
  0x39   : > { %v2432_v50 = vld [vmem:[%s2378_s30 + $0xa6] sm:$0x1]  ;;  %v2435_v51 = vld [vmem:[%s2378_s30 + $0xb6] sm:$0x1]  ;;  %v2441_v53 = vld [vmem:[%s2378_s30 + $0x87] sm:$0x1]  ;;  %v2524_v14 = vadd.f32 %v2438_v52, %v2414_v44 }
  0x3a   : > { %v2444_v54 = vld [vmem:[%s2378_s30 + $0x97] sm:$0x1]  ;;  %v2447_v55 = vld [vmem:[%s2378_s30 + $0xc6] sm:$0x1]  ;;  %v2450_v56 = vld [vmem:[%s2378_s30 + $0xd6] sm:$0x1]  ;;  %v2537_v18 = vadd.f32 %v2441_v53, %v2426_v48 }
  0x3b   : > { %v2453_v57 = vld [vmem:[%s2378_s30 + $0xe6] sm:$0x1]  ;;  %v2456_v58 = vld [vmem:[%s2378_s30 + $0xf6] sm:$0x1]  ;;  %v2459_v59 = vld [vmem:[%s2378_s30 + $0xa7] sm:$0x1]  ;;  %v2541_v19 = vadd.f32 %v2444_v54, %v2429_v49 }
  0x3c   : > { %v2462_v60 = vld [vmem:[%s2378_s30 + $0xb7] sm:$0x1]  ;;  %v2465_v61 = vld [vmem:[%s2378_s30 + $0xc7] sm:$0x1]  ;;  %v2477_v1 = vld [vmem:[%s2378_s30 + $0x8] sm:$0x1]  ;;  %v2545_v20 = vadd.f32 %v2459_v59, %v2432_v50 }
  0x3d   : > { %v2468_v62 = vld [vmem:[%s2378_s30 + $0xd7] sm:$0x1]  ;;  %v2471_v63 = vld [vmem:[%s2378_s30 + $0xe7] sm:$0x1]  ;;  %v2480_v2 = vld [vmem:[%s2378_s30 + $0x18] sm:$0x1]  ;;  %v2549_v21 = vadd.f32 %v2462_v60, %v2435_v51  ;;  %v2562_v25 = vadd.f32 %v2465_v61, %v2447_v55  ;;  %v2587_v32 = vadd.f32 %v2477_v1, %v2393_v37 }
  0x3e   : > { %v2474_v0 = vld [vmem:[%s2378_s30 + $0xf7] sm:$0x1]  ;;  %v2483_v3 = vld [vmem:[%s2378_s30 + $0x28] sm:$0x1]  ;;  %4299 = vst [vmem:[#allocation6_spill] sm:$0xff] %v2487_v4  ;;  %4300 = vst [vmem:[#allocation7_spill] sm:$0xff] %v2491_v5  ;;  %v2566_v26 = vadd.f32 %v2468_v62, %v2450_v56  ;;  %v2570_v27 = vadd.f32 %v2471_v63, %v2453_v57 }
  0x3f   : > { %4301 = vst [vmem:[#allocation8_spill] sm:$0xff] %v2495_v6  ;;  %4302 = vst [vmem:[#allocation9_spill] sm:$0xff] %v2499_v7  ;;  %v2502_v8 = vld [vmem:[%s2378_s30 + $0x38] sm:$0x1]  ;;  %v2505_v9 = vld [vmem:[%s2378_s30 + $0x48] sm:$0x1]  ;;  %v2574_v28 = vadd.f32 %v2474_v0, %v2456_v58 }
  0x40   : > { %v2508_v10 = vld [vmem:[%s2378_s30 + $0x58] sm:$0x1]  ;;  %4303 = vst [vmem:[#allocation10_spill] sm:$0xff] %v2512_v11  ;;  %4304 = vst [vmem:[#allocation11_spill] sm:$0xff] %v2516_v12  ;;  %v2527_v15 = vld [vmem:[%s2378_s30 + $0x68] sm:$0x1] }
  0x41   : > { %4305 = vst [vmem:[#allocation12_spill] sm:$0xff] %v2520_v13  ;;  %4306 = vst [vmem:[#allocation13_spill] sm:$0xff] %v2524_v14  ;;  %v2530_v16 = vld [vmem:[%s2378_s30 + $0x78] sm:$0x1]  ;;  %v2533_v17 = vld [vmem:[%s2378_s30 + $0x88] sm:$0x1] }
  0x42   : > { %4307 = vst [vmem:[#allocation14_spill] sm:$0xff] %v2537_v18  ;;  %4308 = vst [vmem:[#allocation15_spill] sm:$0xff] %v2541_v19  ;;  %v2552_v22 = vld [vmem:[%s2378_s30 + $0x98] sm:$0x1]  ;;  %v2555_v23 = vld [vmem:[%s2378_s30 + $0xa8] sm:$0x1]  ;;  %v2629_v18 = vadd.f32 %v2530_v16, %v2438_v52 }
  0x43   : > { %4309 = vst [vmem:[#allocation16_spill] sm:$0xff] %v2545_v20  ;;  %4310 = vst [vmem:[#allocation17_spill] sm:$0xff] %v2549_v21  ;;  %v2558_v24 = vld [vmem:[%s2378_s30 + $0xb8] sm:$0x1]  ;;  %v2577_v29 = vld [vmem:[%s2378_s30 + $0xc8] sm:$0x1]  ;;  %v2610_v20 = vadd.f32 %v2505_v9, %v2417_v45  ;;  %v2648_v13 = vadd.f32 %v2555_v23, %v2459_v59 }
  0x44   : > { %4311 = vst [vmem:[#allocation18_spill] sm:$0xff] %v2562_v25  ;;  %4312 = vst [vmem:[#allocation19_spill] sm:$0xff] %v2566_v26  ;;  %v2580_v30 = vld [vmem:[%s2378_s30 + $0xd8] sm:$0x1]  ;;  %v2583_v31 = vld [vmem:[%s2378_s30 + $0xe8] sm:$0x1]  ;;  %v2591_v26 = vadd.f32 %v2480_v2, %v2396_v38 }
  0x45   : > { %4313 = vst [vmem:[#allocation20_spill] sm:$0xff] %v2570_v27  ;;  %4314 = vst [vmem:[#allocation21_spill] sm:$0xff] %v2574_v28  ;;  %v2595_v27 = vadd.f32 %v2483_v3, %v2399_v39  ;;  %v2599_v28 = vadd.f32 %v2502_v8, %v2402_v40  ;;  %v2602_v25 = vld [vmem:[%s2378_s30 + $0xf8] sm:$0x1]  ;;  %v2605_v21 = vld [vmem:[%s2378_s30 + $0x9] sm:$0x1] }
  0x46   : > { %4315 = vst [vmem:[#allocation22_spill] sm:$0xff] %v2587_v32  ;;  %4316 = vst [vmem:[#allocation23_spill] sm:$0xff] %v2591_v26  ;;  %v360_v32 = vsub.f32 0.0, %v2381_v33  ;;  %v2614_v26 = vadd.f32 %v2508_v10, %v2420_v46  ;;  %v2624_v19 = vld [vmem:[%s2378_s30 + $0x29] sm:$0x1]  ;;  %v361_v33 = vsub.f32 0.0, %v2384_v34 }
  0x47   : > { %4317 = vst [vmem:[#allocation24_spill] sm:$0xff] %v2595_v27  ;;  %4318 = vst [vmem:[#allocation25_spill] sm:$0xff] %v2599_v28  ;;  %v2618_v27 = vadd.f32 %v2527_v15, %v2423_v47  ;;  %v2621_v28 = vld [vmem:[%s2378_s30 + $0x19] sm:$0x1]  ;;  %v2643_v14 = vld [vmem:[%s2378_s30 + $0x49] sm:$0x1] }
  0x48   : > { %4319 = vst [vmem:[#allocation26_spill] sm:$0xff] %v2610_v20  ;;  %4320 = vst [vmem:[#allocation27_spill] sm:$0xff] %v2614_v26  ;;  %v2633_v20 = vadd.f32 %v2533_v17, %v2441_v53  ;;  %v2637_v26 = vadd.f32 %v2552_v22, %v2444_v54  ;;  %v362_v34 = vsub.f32 0.0, %v2387_v35  ;;  %v2662_v12 = vld [vmem:[%s2378_s30 + $0x69] sm:$0x1]  ;;  %v363_v11 = vsub.f32 0.0, %v2390_v36 }
  0x49   : > { %4321 = vst [vmem:[#allocation28_spill] sm:$0xff] %v2618_v27  ;;  %4322 = vst [vmem:[#allocation29_spill] sm:$0xff] %v2621_v28  ;;  %v2640_v27 = vld [vmem:[%s2378_s30 + $0x39] sm:$0x1]  ;;  %v2667_v35 = vadd.f32 %v2580_v30, %v2468_v62  ;;  %v364_v7 = vsub.f32 0.0, %v2405_v41  ;;  %v2683_v36 = vadd.f32 %v2605_v21, %v2477_v1  ;;  %s1598_s13 = scalar_lea.sflag [#allocation4], %s2371_s27 }
  0x4a   : > { %4323 = vst [vmem:[#allocation30_spill] sm:$0xff] %v2629_v18  ;;  %4324 = vst [vmem:[#allocation31_spill] sm:$0xff] %v2633_v20  ;;  %v2652_v18 = vadd.f32 %v2558_v24, %v2462_v60  ;;  %v2656_v20 = vadd.f32 %v2577_v29, %v2465_v61  ;;  %v376_v6 = vmul.f32 1.442695, %v360_v32  ;;  %v2690_v5 = vld [vmem:[%s2378_s30 + $0x89] sm:$0x1]  ;;  %v2699_v41 = vadd.f32 %v2640_v27, %v2502_v8 }
  0x4b   : > { %4325 = vst [vmem:[#allocation32_spill] sm:$0xff] %v2637_v26  ;;  %4326 = vst [vmem:[#allocation33_spill] sm:$0xff] %v2643_v14  ;;  %v2659_v26 = vld [vmem:[%s2378_s30 + $0x59] sm:$0x1]  ;;  %v378_v4 = vmul.f32 1.442695, %v361_v33 }
  0x4c   : > { %4327 = vst [vmem:[#allocation34_spill] sm:$0xff] %v2648_v13  ;;  %4328 = vst [vmem:[#allocation35_spill] sm:$0xff] %v2652_v18  ;;  %v2671_v13 = vadd.f32 %v2583_v31, %v2471_v63  ;;  %v2675_v18 = vadd.f32 %v2602_v25, %v2474_v0  ;;  %v2702_v32 = vld [vmem:[%s2378_s30 + $0x99] sm:$0x1]  ;;  %v367_v33 = vsub.f32 0.0, %v2414_v44  ;;  %1764 = vpow2.f32 %v376_v6  ;;  %s2148_s15 = scalar_lea.vmem %s1611_s3, 16 }
  0x4d   : > { %4329 = vst [vmem:[#allocation36_spill] sm:$0xff] %v2656_v20  ;;  %4330 = vst [vmem:[#allocation37_spill] sm:$0xff] %v2667_v35  ;;  %v2678_v20 = vld [vmem:[%s2378_s30 + $0x79] sm:$0x1]  ;;  %v2687_v35 = vadd.f32 %v2621_v28, %v2480_v2  ;;  %v380_v28 = vmul.f32 1.442695, %v362_v34  ;;  %1766 = vpow2.f32 %v378_v4  ;;  %p2149_p0 = scmp.ne.s32.totalorder %s1611_s3, %s2148_s15 }
  0x4e   : > { %4331 = vst [vmem:[#allocation38_spill] sm:$0xff] %v2671_v13  ;;  %4332 = vst [vmem:[#allocation39_spill] sm:$0xff] %v2675_v18  ;;  %v365_v13 = vsub.f32 0.0, %v2408_v42  ;;  %v2695_v18 = vadd.f32 %v2624_v19, %v2483_v3  ;;  %v2711_v42 = vadd.f32 %v2659_v26, %v2508_v10  ;;  %v2723_v34 = vld [vmem:[%s2378_s30 + $0xa9] sm:$0x1]  ;;  %v371_v6 = vsub.f32 0.0, %v2435_v51 }
  0x4f   : > { %4333 = vst [vmem:[#allocation40_spill] sm:$0xff] %v2678_v20  ;;  %4334 = vst [vmem:[#allocation41_spill] sm:$0xff] %v2683_v36  ;;  %v366_v36 = vsub.f32 0.0, %v2411_v43  ;;  %v2720_v43 = vadd.f32 %v2678_v20, %v2530_v16  ;;  %v2731_v44 = vld [vmem:[%s2378_s30 + $0xb9] sm:$0x1]  ;;  %1768 = vpow2.f32 %v380_v28  ;;  %v2752_v51 = vadd.f32 %v2723_v34, %v2555_v23  ;;  %p2150_p1 = pnand %p2149_p0, %p2277_p5  ;;  %s2227_s17 = smov [#allocation3]  }
  0x50   : > { %4335 = vst [vmem:[#allocation42_spill] sm:$0xff] %v2687_v35  ;;  %4336 = vst [vmem:[#allocation43_spill] sm:$0xff] %v2690_v5  ;;  %v2707_v35 = vadd.f32 %v2643_v14, %v2505_v9  ;;  %v384_v14 = vmul.f32 1.442695, %v364_v7  ;;  %v2739_v20 = vld [vmem:[%s2378_s30 + $0xc9] sm:$0x1]  ;;  %v2756_v28 = vadd.f32 %v2731_v44, %v2558_v24 }
  0x51   : > { %4337 = vst [vmem:[#allocation44_spill] sm:$0xff] %v2695_v18  ;;  %4338 = vst [vmem:[#allocation45_spill] sm:$0xff] %v2699_v41  ;;  %v382_v18 = vmul.f32 1.442695, %v363_v11  ;;  %v2716_v41 = vadd.f32 %v2662_v12, %v2527_v15  ;;  %v369_v11 = vsub.f32 0.0, %v2429_v49  ;;  %v373_v49 = vsub.f32 0.0, %v2450_v56  ;;  %p2151_p2 = pneg %p2150_p1 }
  0x52   : > { %4339 = vst [vmem:[#allocation46_spill] sm:$0xff] %v2702_v32  ;;  %4340 = vst [vmem:[#allocation47_spill] sm:$0xff] %v2707_v35  ;;  %v368_v35 = vsub.f32 0.0, %v2426_v48  ;;  %v370_v48 = vsub.f32 0.0, %v2432_v50  ;;  %v388_v7 = vmul.f32 1.442695, %v366_v36  ;;  %v2760_v56 = vadd.f32 %v2739_v20, %v2577_v29 }
  0x53   : > { %4341 = vst [vmem:[#allocation48_spill] sm:$0xff] %v2711_v42  ;;  %4342 = vst [vmem:[#allocation49_spill] sm:$0xff] %v2716_v41  ;;  %v2728_v42 = vadd.f32 %v2690_v5, %v2533_v17  ;;  %v386_v41 = vmul.f32 1.442695, %v365_v13  ;;  %v2744_v5 = vld [vmem:[%s2378_s30 + $0xd9] sm:$0x1]  ;;  %1770 = vpow2.f32 %v382_v18 }
  0x54   : > { %4343 = vst [vmem:[#allocation50_spill] sm:$0xff] %v2720_v43  ;;  %v2736_v43 = vadd.f32 %v2702_v32, %v2552_v22  ;;  %v390_v4 = vmul.f32 1.442695, %v367_v33  ;;  %v374_v13 = vsub.f32 0.0, %v2453_v57  ;;  %1772 = vpow2.f32 %v384_v14  ;;  %4346 = vst [vmem:[#allocation53_spill] sm:$0xff] %v2752_v51  ;;  %s2152_s20 = sshll.u32 %s2227_s17, 4  ;;  %s2153_s20 = int_to_ptr.vmem [resolvable:$false] %s2152_s20 }
  0x55   : > { %4344 = vst [vmem:[#allocation51_spill] sm:$0xff] %v2728_v42  ;;  %v372_v42 = vsub.f32 0.0, %v2447_v55  ;;  %v392_v32 = vmul.f32 1.442695, %v368_v35  ;;  %1774 = vpow2.f32 %v386_v41  ;;  %v394_v50 = vmul.f32 1.442695, %v369_v11  ;;  %p2155_p3 = scmp.lt.s32.totalorder %s1611_s3, %s2153_s20 }
  0x56   : > { %4345 = vst [vmem:[#allocation52_spill] sm:$0xff] %v2736_v43  ;;  %v375_v43 = vsub.f32 0.0, %v2456_v58  ;;  %4347 = vst [vmem:[#allocation54_spill] sm:$0xff] %v2756_v28  ;;  %1776 = vpow2.f32 %v388_v7  ;;  %v396_v55 = vmul.f32 1.442695, %v370_v48  ;;  %v2764_v57 = vadd.f32 %v2744_v5, %v2580_v30  ;;  %s2154_s21 = scalar_lea.vmem %s2153_s20, 32 }
  0x57   : > { %4348 = vst [vmem:[#allocation55_spill] sm:$0xff] %v2760_v56  ;;  %1778 = vpow2.f32 %v390_v4  ;;  %v398_v58 = vmul.f32 1.442695, %v371_v6  ;;  %v400_v14 = vmul.f32 1.442695, %v372_v42  ;;  %v408_v41 = vsub.f32 0.0, %v2393_v37  ;;  %p2156_p4 = scmp.lt.s32.totalorder %s2154_s21, %s2148_s15 }
  0x58   : > { %4349 = vst [vmem:[#allocation56_spill] sm:$0xff] %v2764_v57  ;;  %v402_v18 = vmul.f32 1.442695, %v373_v49  ;;  %1780 = vpow2.f32 %v392_v32  ;;  %v404_v35 = vmul.f32 1.442695, %v374_v13  ;;  %v409_v33 = vsub.f32 0.0, %v2396_v38 }
  0x59   : > { %v406_v36 = vmul.f32 1.442695, %v375_v43  ;;  %1782 = vpow2.f32 %v394_v50  ;;  %v410_v11 = vsub.f32 0.0, %v2399_v39  ;;  %v411_v48 = vsub.f32 0.0, %v2402_v40  ;;  %v2778_v6 = vpop.eup %1764  ;;  %v2973_v28 = vld [vmem:[%s2378_s30 + $0xb0] sm:$0x1]  ;;  %p2157_p6 = por %p2156_p4, %p2155_p3 }
  0x5a   : > { %1784 = vpow2.f32 %v396_v55  ;;  %v412_v7 = vsub.f32 0.0, %v2417_v45  ;;  %v413_v4 = vsub.f32 0.0, %v2420_v46  ;;  %v414_v42 = vsub.f32 0.0, %v2423_v47  ;;  %v2782_v49 = vpop.eup %1766 }
  0x5b   : > { %1786 = vpow2.f32 %v398_v58  ;;  %v415_v32 = vsub.f32 0.0, %v2438_v52  ;;  %v416_v43 = vsub.f32 0.0, %v2441_v53  ;;  %v417_v37 = vsub.f32 0.0, %v2444_v54  ;;  %p2158_p7 = pnand %p2157_p6, %p2151_p2 }
  0x5c   : > { %1788 = vpow2.f32 %v400_v14  ;;  %v418_v38 = vsub.f32 0.0, %v2459_v59  ;;  %v419_v39 = vsub.f32 0.0, %v2462_v60  ;;  %v424_v40 = vmul.f32 1.442695, %v408_v41  ;;  %v2786_v59 = vpop.eup %1768 }
  0x5d   : > { %1790 = vpow2.f32 %v402_v18  ;;  %v420_v45 = vsub.f32 0.0, %v2465_v61  ;;  %v421_v46 = vsub.f32 0.0, %v2468_v62  ;;  %v426_v47 = vmul.f32 1.442695, %v409_v33 }
  0x5e   : > { %1792 = vpow2.f32 %v404_v35  ;;  %v422_v52 = vsub.f32 0.0, %v2471_v63  ;;  %v423_v53 = vsub.f32 0.0, %v2474_v0  ;;  %v428_v54 = vmul.f32 1.442695, %v410_v11 }
  0x5f   : > { %1794 = vpow2.f32 %v406_v36  ;;  %v430_v60 = vmul.f32 1.442695, %v411_v48  ;;  %v432_v13 = vmul.f32 1.442695, %v412_v7  ;;  %v434_v50 = vmul.f32 1.442695, %v413_v4 }
  0x60   : > { %v2788_v55 = vpop.eup %1770  ;;  %1796 = vpow2.f32 %v424_v40  ;;  %v436_v61 = vmul.f32 1.442695, %v414_v42  ;;  %v438_v62 = vmul.f32 1.442695, %v415_v32  ;;  %v440_v58 = vmul.f32 1.442695, %v416_v43 }
  0x61   : > { %v2790_v14 = vpop.eup %1772  ;;  %1798 = vpow2.f32 %v426_v47  ;;  %v442_v18 = vmul.f32 1.442695, %v417_v37  ;;  %v444_v63 = vmul.f32 1.442695, %v418_v38  ;;  %v446_v35 = vmul.f32 1.442695, %v419_v39 }
  0x62   : > { %v2792_v0 = vpop.eup %1774  ;;  %1800 = vpow2.f32 %v428_v54  ;;  %v448_v41 = vmul.f32 1.442695, %v420_v45  ;;  %v450_v36 = vmul.f32 1.442695, %v421_v46  ;;  %v452_v33 = vmul.f32 1.442695, %v422_v52 }
  0x63   : > { %v2794_v11 = vpop.eup %1776  ;;  %1802 = vpow2.f32 %v430_v60  ;;  %v454_v48 = vmul.f32 1.442695, %v423_v53  ;;  %v472_v7 = vsub.f32 0.0, %v2477_v1  ;;  %v473_v4 = vsub.f32 0.0, %v2480_v2 }
  0x64   : > { %v2798_v42 = vpop.eup %1778  ;;  %1804 = vpow2.f32 %v432_v13  ;;  %v474_v32 = vsub.f32 0.0, %v2483_v3  ;;  %v475_v43 = vsub.f32 0.0, %v2502_v8  ;;  %v476_v37 = vsub.f32 0.0, %v2505_v9 }
  0x65   : > { %v2803_v38 = vpop.eup %1780  ;;  %1806 = vpow2.f32 %v434_v50  ;;  %v477_v39 = vsub.f32 0.0, %v2508_v10  ;;  %v478_v40 = vsub.f32 0.0, %v2527_v15  ;;  %v479_v1 = vsub.f32 0.0, %v2530_v16 }
  0x66   : > { %v2808_v45 = vpop.eup %1782  ;;  %1808 = vpow2.f32 %v436_v61  ;;  %v480_v2 = vsub.f32 0.0, %v2533_v17  ;;  %v481_v3 = vsub.f32 0.0, %v2552_v22  ;;  %v482_v8 = vsub.f32 0.0, %v2555_v23 }
  0x67   : > { %v2813_v46 = vpop.eup %1784  ;;  %1810 = vpow2.f32 %v438_v62  ;;  %v483_v9 = vsub.f32 0.0, %v2558_v24  ;;  %v484_v10 = vsub.f32 0.0, %v2577_v29  ;;  %v485_v15 = vsub.f32 0.0, %v2580_v30 }
  0x68   : > { %v2818_v47 = vpop.eup %1786  ;;  %1812 = vpow2.f32 %v440_v58  ;;  %v486_v16 = vsub.f32 0.0, %v2583_v31  ;;  %v487_v17 = vsub.f32 0.0, %v2602_v25  ;;  %v488_v52 = vmul.f32 1.442695, %v472_v7 }
  0x69   : > { %v2822_v22 = vpop.eup %1788  ;;  %1814 = vpow2.f32 %v442_v18  ;;  %v490_v23 = vmul.f32 1.442695, %v473_v4  ;;  %v492_v53 = vmul.f32 1.442695, %v474_v32  ;;  %v494_v54 = vmul.f32 1.442695, %v475_v43 }
  0x6a   : > { %v2824_v60 = vpop.eup %1790  ;;  %1816 = vpow2.f32 %v444_v63  ;;  %v496_v24 = vmul.f32 1.442695, %v476_v37  ;;  %v498_v29 = vmul.f32 1.442695, %v477_v39  ;;  %v500_v30 = vmul.f32 1.442695, %v478_v40 }
  0x6b   : > { %v2826_v13 = vpop.eup %1792  ;;  %1818 = vpow2.f32 %v446_v35  ;;  %v2828_v50 = vmul.f32 1.442695, %v479_v1  ;;  %v2830_v31 = vmul.f32 1.442695, %v480_v2  ;;  %v2832_v25 = vmul.f32 1.442695, %v481_v3 }
  0x6c   : > { %v2834_v61 = vpop.eup %1794  ;;  %1820 = vpow2.f32 %v448_v41  ;;  %v2836_v62 = vmul.f32 1.442695, %v482_v8  ;;  %v2838_v58 = vmul.f32 1.442695, %v483_v9  ;;  %v2840_v18 = vmul.f32 1.442695, %v484_v10 }
  0x6d   : > { %v1797_v63 = vpop.eup %1796  ;;  %1822 = vpow2.f32 %v450_v36  ;;  %v2842_v7 = vmul.f32 1.442695, %v485_v15  ;;  %v2844_v35 = vmul.f32 1.442695, %v486_v16  ;;  %v2846_v4 = vmul.f32 1.442695, %v487_v17 }
  0x6e   : > { %v1799_v32 = vpop.eup %1798  ;;  %1824 = vpow2.f32 %v452_v33  ;;  %v536_v43 = vsub.f32 0.0, %v2605_v21  ;;  %v4350_v41 = vld [vmem:[#allocation29_spill] sm:$0xff]  ;;  %v538_v39 = vsub.f32 0.0, %v2624_v19  ;;  %v539_v36 = vsub.f32 0.0, %v2640_v27  ;;  %v4352_v33 = vld [vmem:[#allocation40_spill] sm:$0xff]  ;;  %v4353_v21 = vld [vmem:[#allocation43_spill] sm:$0xff] }
  0x6f   : > { %v537_v37 = vsub.f32 0.0, %v4350_v41  ;;  %v1801_v40 = vpop.eup %1800  ;;  %1826 = vpow2.f32 %v454_v48  ;;  %v4351_v1 = vld [vmem:[#allocation33_spill] sm:$0xff]  ;;  %v541_v3 = vsub.f32 0.0, %v2659_v26  ;;  %v542_v9 = vsub.f32 0.0, %v2662_v12  ;;  %v2858_v17 = vld [vmem:[%s2378_s30 + $0xe9] sm:$0x1] }
  0x70   : > { %v540_v2 = vsub.f32 0.0, %v4351_v1  ;;  %v1803_v8 = vpop.eup %1802  ;;  %1828 = vpow2.f32 %v488_v52  ;;  %v543_v10 = vsub.f32 0.0, %v4352_v33  ;;  %v544_v15 = vsub.f32 0.0, %v4353_v21  ;;  %4354 = vst [vmem:[#allocation29_spill] sm:$0xff] %v2858_v17  ;;  %v4355_v19 = vld [vmem:[#allocation46_spill] sm:$0xff] }
  0x71   : > { %v1805_v16 = vpop.eup %1804  ;;  %1830 = vpow2.f32 %v490_v23  ;;  %v545_v48 = vsub.f32 0.0, %v4355_v19  ;;  %v546_v27 = vsub.f32 0.0, %v2723_v34  ;;  %v547_v41 = vsub.f32 0.0, %v2731_v44  ;;  %v2864_v26 = vld [vmem:[%s2378_s30 + $0xf9] sm:$0x1] }
  0x72   : > { %v1807_v1 = vpop.eup %1806  ;;  %4356 = vst [vmem:[#allocation33_spill] sm:$0xff] %v2864_v26  ;;  %1832 = vpow2.f32 %v492_v53  ;;  %v548_v12 = vsub.f32 0.0, %v2739_v20  ;;  %v549_v52 = vsub.f32 0.0, %v2744_v5  ;;  %v550_v33 = vsub.f32 0.0, %v2858_v17 }
  0x73   : > { %v1809_v21 = vpop.eup %1808  ;;  %v2870_v57 = vadd.f32 %v1797_v63, %v2778_v6  ;;  %1834 = vpow2.f32 %v494_v54  ;;  %v551_v23 = vsub.f32 0.0, %v2864_v26  ;;  %v2873_v34 = vmul.f32 1.442695, %v536_v43  ;;  %v4363_v26 = vld [vmem:[#allocation7_spill] sm:$0xff] }
  0x74   : > { %v1811_v44 = vpop.eup %1810  ;;  %v2876_v19 = vadd.f32 %v1799_v32, %v2782_v49  ;;  %1836 = vpow2.f32 %v496_v24  ;;  %v2878_v20 = vmul.f32 1.442695, %v537_v37  ;;  %v2880_v5 = vmul.f32 1.442695, %v538_v39  ;;  %v2897_v37 = vld [vmem:[%s2378_s30] sm:$0x1] }
  0x75   : > { %v1813_v53 = vpop.eup %1812  ;;  %v2883_v6 = vadd.f32 %v1801_v40, %v2786_v59  ;;  %1838 = vpow2.f32 %v498_v29  ;;  %v2885_v54 = vmul.f32 1.442695, %v539_v36  ;;  %v2887_v63 = vmul.f32 1.442695, %v540_v2  ;;  %v2911_v40 = vld [vmem:[%s2378_s30 + $0x20] sm:$0x1] }
  0x76   : > { %v1815_v43 = vpop.eup %1814  ;;  %v2890_v49 = vadd.f32 %v1803_v8, %v2788_v55  ;;  %1840 = vpow2.f32 %v500_v30  ;;  %v2892_v24 = vmul.f32 1.442695, %v541_v3  ;;  %v2894_v32 = vmul.f32 1.442695, %v542_v9  ;;  %v2908_v30 = vld [vmem:[%s2378_s30 + $0x10] sm:$0x1] }
  0x77   : > { %v1817_v59 = vpop.eup %1816  ;;  %v2900_v29 = vadd.f32 %v1805_v16, %v2790_v14  ;;  %1842 = vpow2.f32 %v2828_v50  ;;  %v2903_v39 = vmul.f32 1.442695, %v543_v10  ;;  %v2905_v55 = vmul.f32 1.442695, %v544_v15  ;;  %v2922_v3 = vld [vmem:[%s2378_s30 + $0x30] sm:$0x1] }
  0x78   : > { %v1819_v36 = vpop.eup %1818  ;;  %v2914_v2 = vadd.f32 %v1807_v1, %v2792_v0  ;;  %1844 = vpow2.f32 %v2830_v31  ;;  %v2917_v14 = vmul.f32 1.442695, %v545_v48  ;;  %v2919_v50 = vmul.f32 1.442695, %v546_v27  ;;  %v2925_v8 = vld [vmem:[%s2378_s30 + $0x40] sm:$0x1] }
  0x79   : > { %v1821_v9 = vpop.eup %1820  ;;  %v2928_v10 = vadd.f32 %v1809_v21, %v2794_v11  ;;  %1846 = vpow2.f32 %v2832_v25  ;;  %v2931_v0 = vmul.f32 1.442695, %v547_v41  ;;  %v2933_v31 = vmul.f32 1.442695, %v548_v12  ;;  %v2936_v15 = vld [vmem:[%s2378_s30 + $0x50] sm:$0x1] }
  0x7a   : > { %v2939_v16 = vld [vmem:[%s2378_s30 + $0x60] sm:$0x1]  ;;  %v1823_v48 = vpop.eup %1822  ;;  %v2942_v27 = vadd.f32 %v1811_v44, %v2798_v42  ;;  %1848 = vpow2.f32 %v2836_v62  ;;  %v2945_v11 = vmul.f32 1.442695, %v549_v52  ;;  %v2947_v25 = vmul.f32 1.442695, %v550_v33 }
  0x7b   : > { %v2950_v41 = vld [vmem:[%s2378_s30 + $0x70] sm:$0x1]  ;;  %v2953_v1 = vld [vmem:[%s2378_s30 + $0x80] sm:$0x1]  ;;  %v1825_v12 = vpop.eup %1824  ;;  %v2956_v21 = vadd.f32 %v1813_v53, %v2803_v38  ;;  %1850 = vpow2.f32 %v2838_v58  ;;  %v2959_v42 = vmul.f32 1.442695, %v551_v23  ;;  %v2969_v56 = vadd.f32 %v1815_v43, %v2808_v45 }
  0x7c   : > { %4357 = vst [vmem:[#allocation40_spill] sm:$0xff] %v2945_v11  ;;  %4358 = vst [vmem:[#allocation43_spill] sm:$0xff] %v2947_v25  ;;  %v2962_v44 = vld [vmem:[%s2378_s30 + $0x90] sm:$0x1]  ;;  %v2965_v62 = vld [vmem:[%s2378_s30 + $0xa0] sm:$0x1]  ;;  %v1827_v33 = vpop.eup %1826  ;;  %1852 = vpow2.f32 %v2840_v18  ;;  %v2978_v53 = vadd.f32 %v1817_v59, %v2813_v46  ;;  %v2987_v51 = vadd.f32 %v1819_v36, %v2818_v47  ;;  %v2996_v38 = vadd.f32 %v1821_v9, %v2822_v22 }
  0x7d   : > { %4359 = vst [vmem:[#allocation46_spill] sm:$0xff] %v2959_v42  ;;  %v1829_v23 = vpop.eup %1828  ;;  %1854 = vpow2.f32 %v2842_v7  ;;  %v2982_v52 = vld [vmem:[%s2378_s30 + $0xc0] sm:$0x1]  ;;  %v2991_v58 = vld [vmem:[%s2378_s30 + $0xd0] sm:$0x1] }
  0x7e   : > { %v1831_v18 = vpop.eup %1830  ;;  %1856 = vpow2.f32 %v2844_v35  ;;  %v3000_v43 = vld [vmem:[%s2378_s30 + $0xe0] sm:$0x1]  ;;  %v3005_v35 = vadd.f32 %v1823_v48, %v2824_v60  ;;  %v3009_v46 = vld [vmem:[%s2378_s30 + $0xf0] sm:$0x1]  ;;  %v3020_v48 = vadd.f32 %v1827_v33, %v2834_v61  ;;  %v665_v45 = vand.u32 2147483647, %v4363_v26 }
  0x7f   : > { %v1833_v7 = vpop.eup %1832  ;;  %1858 = vpow2.f32 %v2846_v4  ;;  %4360 = vst [vmem:[#allocation57_spill] sm:$0xff] %v3000_v43  ;;  %4361 = vst [vmem:[#allocation58_spill] sm:$0xff] %v3009_v46  ;;  %v3014_v4 = vadd.f32 %v1825_v12, %v2826_v13  ;;  %v3026_v13 = vadd.f32 %v1829_v23, %v2870_v57  ;;  %v4362_v12 = vld [vmem:[#allocation6_spill] sm:$0xff]  ;;  %v3032_v61 = vadd.f32 %v1831_v18, %v2876_v19  ;;  %v4370_v26 = vld [vmem:[#allocation11_spill] sm:$0xff] }
  0x80   : > { %v1835_v36 = vpop.eup %1834  ;;  %1860 = vpow2.f32 %v2873_v34  ;;  %v664_v47 = vand.u32 2147483647, %v4362_v12  ;;  %v4366_v34 = vld [vmem:[#allocation9_spill] sm:$0xff]  ;;  %v3038_v57 = vadd.f32 %v1833_v7, %v2883_v6  ;;  %v669_v46 = vand.u32 2147483647, %v4370_v26 }
  0x81   : > { %v1837_v9 = vpop.eup %1836  ;;  %1862 = vpow2.f32 %v2878_v20  ;;  %4364 = vst [vmem:[#allocation59_spill] sm:$0xff] %v3032_v61  ;;  %v667_v22 = vand.u32 2147483647, %v4366_v34  ;;  %v3041_v23 = vadd.f32 %v1835_v36, %v2890_v49  ;;  %v4369_v20 = vld [vmem:[#allocation10_spill] sm:$0xff]  ;;  %v4376_v49 = vld [vmem:[#allocation15_spill] sm:$0xff]  ;;  %v4377_v36 = vld [vmem:[#allocation16_spill] sm:$0xff] }
  0x82   : > { %v1839_v60 = vpop.eup %1838  ;;  %1864 = vpow2.f32 %v2880_v5  ;;  %v4365_v5 = vld [vmem:[#allocation8_spill] sm:$0xff]  ;;  %4367 = vst [vmem:[#allocation60_spill] sm:$0xff] %v3038_v57  ;;  %v668_v12 = vand.u32 2147483647, %v4369_v20  ;;  %v3046_v19 = vadd.f32 %v1837_v9, %v2900_v29  ;;  %v4374_v34 = vld [vmem:[#allocation14_spill] sm:$0xff]  ;;  %v4378_v9 = vld [vmem:[#allocation17_spill] sm:$0xff] }
  0x83   : > { %v1841_v59 = vpop.eup %1840  ;;  %1866 = vpow2.f32 %v2885_v54  ;;  %v666_v33 = vand.u32 2147483647, %v4365_v5  ;;  %4368 = vst [vmem:[#allocation61_spill] sm:$0xff] %v3041_v23  ;;  %v4372_v54 = vld [vmem:[#allocation12_spill] sm:$0xff]  ;;  %v4373_v5 = vld [vmem:[#allocation13_spill] sm:$0xff]  ;;  %v3052_v6 = vadd.f32 %v1839_v60, %v2914_v2  ;;  %v4380_v60 = vld [vmem:[#allocation19_spill] sm:$0xff] }
  0x84   : > { %v1843_v17 = vpop.eup %1842  ;;  %4371 = vst [vmem:[#allocation62_spill] sm:$0xff] %v3046_v19  ;;  %v670_v18 = vand.u32 2147483647, %v4372_v54  ;;  %v671_v25 = vand.u32 2147483647, %v4373_v5  ;;  %1868 = vpow2.f32 %v2887_v63  ;;  %v3058_v29 = vadd.f32 %v1841_v59, %v2928_v10  ;;  %v4379_v54 = vld [vmem:[#allocation18_spill] sm:$0xff] }
  0x85   : > { %v1845_v42 = vpop.eup %1844  ;;  %v672_v61 = vand.u32 2147483647, %v4374_v34  ;;  %4375 = vst [vmem:[#allocation63_spill] sm:$0xff] %v3052_v6  ;;  %v673_v7 = vand.u32 2147483647, %v4376_v49  ;;  %1870 = vpow2.f32 %v2892_v24  ;;  %v3064_v2 = vadd.f32 %v1843_v17, %v2942_v27  ;;  %v4381_v6 = vld [vmem:[#allocation20_spill] sm:$0xff] }
  0x86   : > { %v1847_v43 = vpop.eup %1846  ;;  %v674_v26 = vand.u32 2147483647, %v4377_v36  ;;  %v675_v5 = vand.u32 2147483647, %v4378_v9  ;;  %v676_v34 = vand.u32 2147483647, %v4379_v54  ;;  %v3070_v10 = vadd.f32 %v1845_v42, %v2956_v21 }
  0x87   : > { %v1849_v11 = vpop.eup %1848  ;;  %v677_v63 = vand.u32 2147483647, %v4380_v60  ;;  %v678_v49 = vand.u32 2147483647, %v4381_v6  ;;  %v4382_v23 = vld [vmem:[#allocation21_spill] sm:$0xff]  ;;  %1872 = vpow2.f32 %v2894_v32  ;;  %v3078_v27 = vadd.f32 %v1847_v43, %v2969_v56 }
  0x88   : > { %v1851_v20 = vpop.eup %1850  ;;  %v679_v36 = vand.u32 2147483647, %v4382_v23  ;;  %4383 = vst [vmem:[#allocation64_spill] sm:$0xff] %v3070_v10  ;;  %v4384_v24 = vand.u32 2147483647, %v2897_v37  ;;  %1874 = vpow2.f32 %v2903_v39  ;;  %v3086_v32 = vadd.f32 %v1849_v11, %v2978_v53 }
  0x89   : > { %v1853_v19 = vpop.eup %1852  ;;  %v4385_v54 = vand.u32 2147483647, %v2908_v30  ;;  %4386 = vst [vmem:[#allocation65_spill] sm:$0xff] %v3078_v27  ;;  %v4387_v23 = vand.u32 2147483647, %v2911_v40  ;;  %1876 = vpow2.f32 %v2905_v55  ;;  %v3094_v39 = vadd.f32 %v1851_v20, %v2987_v51 }
  0x8a   : > { %v1855_v57 = vpop.eup %1854  ;;  %v680_v59 = vsub.f32 %v4384_v24, %v664_v47  ;;  %v4388_v21 = vand.u32 2147483647, %v2922_v3  ;;  %4389 = vst [vmem:[#allocation66_spill] sm:$0xff] %v3086_v32  ;;  %v4390_v37 = vand.u32 2147483647, %v2925_v8  ;;  %1878 = vpow2.f32 %v2917_v14 }
  0x8b   : > { %v681_v9 = vsub.f32 %v4385_v54, %v665_v45  ;;  %v1857_v17 = vpop.eup %1856  ;;  %v682_v6 = vsub.f32 %v4387_v23, %v666_v33  ;;  %v4391_v56 = vand.u32 2147483647, %v2936_v15  ;;  %4392 = vst [vmem:[#allocation67_spill] sm:$0xff] %v3094_v39  ;;  %v4393_v40 = vand.u32 2147483647, %v2939_v16 }
  0x8c   : > { %v683_v42 = vsub.f32 %v4388_v21, %v667_v22  ;;  %v1859_v10 = vpop.eup %1858  ;;  %v684_v30 = vsub.f32 %v4390_v37, %v668_v12  ;;  %v4394_v11 = vand.u32 2147483647, %v2950_v41  ;;  %v3104_v8 = vadd.f32 %v1853_v19, %v2996_v38 }
  0x8d   : > { %v685_v45 = vsub.f32 %v4391_v56, %v669_v46  ;;  %v1861_v43 = vpop.eup %1860  ;;  %v686_v3 = vsub.f32 %v4393_v40, %v670_v18  ;;  %1880 = vpow2.f32 %v2919_v50  ;;  %v4396_v15 = vand.u32 2147483647, %v2953_v1  ;;  %v4418_v40 = vld [vmem:[#allocation62_spill] sm:$0xff] }
  0x8e   : > { %v3101_v53 = vsub.f32 %v4394_v11, %v671_v25  ;;  %v1863_v55 = vpop.eup %1862  ;;  %4395 = vst [vmem:[#allocation68_spill] sm:$0xff] %v3104_v8  ;;  %v4397_v51 = vand.u32 2147483647, %v2962_v44  ;;  %v3116_v47 = vadd.f32 %v1855_v57, %v3005_v35  ;;  %1882 = vpow2.f32 %v2931_v0  ;;  %v4408_v57 = vld [vmem:[#allocation43_spill] sm:$0xff] }
  0x8f   : > { %v3109_v46 = vsub.f32 %v4396_v15, %v672_v61  ;;  %v1865_v16 = vpop.eup %1864  ;;  %v4399_v25 = vand.u32 2147483647, %v2965_v62  ;;  %v4400_v50 = vand.u32 2147483647, %v2973_v28  ;;  %v3128_v1 = vadd.f32 %v1857_v17, %v3014_v4  ;;  %v4405_v4 = vld [vmem:[#allocation40_spill] sm:$0xff]  ;;  %v4406_v61 = vld [vmem:[#allocation59_spill] sm:$0xff] }
  0x90   : > { %v3113_v14 = vsub.f32 %v4397_v51, %v673_v7  ;;  %4398 = vst [vmem:[#allocation69_spill] sm:$0xff] %v3116_v47  ;;  %1884 = vpow2.f32 %v2933_v31  ;;  %v584_v44 = vadd.f32 %v1861_v43, %v3026_v13  ;;  %v696_v22 = vand.u32 2147483647, %v680_v59  ;;  %v1867_v35 = vpop.eup %1866  ;;  %v4413_v7 = vld [vmem:[#allocation61_spill] sm:$0xff]  ;;  %v4448_v8 = vld [vmem:[#allocation39_spill] sm:$0xff] }
  0x91   : > { %v3121_v41 = vsub.f32 %v4399_v25, %v674_v26  ;;  %v3125_v38 = vsub.f32 %v4400_v50, %v675_v5  ;;  %4401 = vst [vmem:[#allocation70_spill] sm:$0xff] %v3128_v1  ;;  %v3133_v20 = vadd.f32 %v1859_v10, %v3020_v48  ;;  %v4403_v0 = vand.u32 2147483647, %v2982_v52  ;;  %v4407_v5 = vld [vmem:[#allocation60_spill] sm:$0xff]  ;;  %v4409_v48 = vld [vmem:[#allocation57_spill] sm:$0xff]  ;;  %v4411_v52 = vld [vmem:[#allocation58_spill] sm:$0xff]  ;;  %v1869_v18 = vpop.eup %1868 }
  0x92   : > { %v4404_v28 = vand.u32 2147483647, %v2991_v58  ;;  %v697_v12 = vand.u32 2147483647, %v681_v9  ;;  %1886 = vpow2.f32 %v4405_v4  ;;  %v585_v31 = vadd.f32 %v1863_v55, %v4406_v61  ;;  %v1871_v59 = vpop.eup %1870  ;;  %v3183_v4 = vld [vmem:[%s2378_s30 + $0x1] sm:$0x1] }
  0x93   : > { %4402 = vst [vmem:[#allocation71_spill] sm:$0xff] %v3133_v20  ;;  %v3137_v26 = vsub.f32 %v4403_v0, %v676_v34  ;;  %v586_v13 = vadd.f32 %v1865_v16, %v4407_v5  ;;  %v698_v33 = vand.u32 2147483647, %v682_v6  ;;  %1888 = vpow2.f32 %v4408_v57  ;;  %v4415_v6 = vld [vmem:[#allocation46_spill] sm:$0xff]  ;;  %v4419_v16 = vld [vmem:[#allocation63_spill] sm:$0xff] }
  0x94   : > { %v3141_v62 = vsub.f32 %v4404_v28, %v677_v63  ;;  %v4410_v23 = vand.u32 2147483647, %v4409_v48  ;;  %v4412_v34 = vand.u32 2147483647, %v4411_v52  ;;  %v699_v58 = vand.u32 2147483647, %v683_v42  ;;  %v1873_v43 = vpop.eup %1872 }
  0x95   : > { %v587_v9 = vadd.f32 %v1867_v35, %v4413_v7  ;;  %v3156_v63 = vmul.f32 0.25, %v584_v44  ;;  %v700_v10 = vand.u32 2147483647, %v684_v30  ;;  %v712_v24 = vmul.f32 1.442695, %v696_v22  ;;  %v1875_v51 = vpop.eup %1874 }
  0x96   : > { %v3149_v19 = vsub.f32 %v4410_v23, %v678_v49  ;;  %v3153_v54 = vsub.f32 %v4412_v34, %v679_v36  ;;  %1890 = vpow2.f32 %v4415_v6  ;;  %v701_v17 = vand.u32 2147483647, %v685_v45  ;;  %v3170_v50 = vpop.eup %1876  ;;  %v3186_v61 = vld [vmem:[%s2378_s30 + $0x11] sm:$0x1]  ;;  %v3202_v57 = vld [vmem:[%s2378_s30 + $0x41] sm:$0x1] }
  0x97   : > { %4414 = vst [vmem:[#allocation40_spill] sm:$0xff] %v3156_v63  ;;  %v702_v21 = vand.u32 2147483647, %v686_v3  ;;  %v714_v37 = vmul.f32 1.442695, %v697_v12  ;;  %v3159_v49 = vmul.f32 0.25, %v585_v31  ;;  %v588_v11 = vadd.f32 %v1869_v18, %v4418_v40 }
  0x98   : > { %v3161_v56 = vmul.f32 0.25, %v586_v13  ;;  %v703_v36 = vand.u32 2147483647, %v3101_v53  ;;  %v716_v42 = vmul.f32 1.442695, %v698_v33  ;;  %v589_v45 = vadd.f32 %v1871_v59, %v4419_v16  ;;  %4421 = vst [vmem:[#allocation57_spill] sm:$0xff] %v3170_v50 }
  0x99   : > { %4416 = vst [vmem:[#allocation59_spill] sm:$0xff] %v3159_v49  ;;  %v704_v55 = vand.u32 2147483647, %v3109_v46  ;;  %v705_v30 = vand.u32 2147483647, %v3113_v14  ;;  %v3168_v3 = vmul.f32 0.25, %v587_v9  ;;  %1892 = vpow2.f32 %v712_v24  ;;  %v3174_v14 = vpop.eup %1878 }
  0x9a   : > { %4417 = vst [vmem:[#allocation60_spill] sm:$0xff] %v3161_v56  ;;  %v718_v15 = vmul.f32 1.442695, %v699_v58  ;;  %v720_v25 = vmul.f32 1.442695, %v700_v10  ;;  %1894 = vpow2.f32 %v714_v37  ;;  %4422 = vst [vmem:[#allocation58_spill] sm:$0xff] %v3174_v14  ;;  %v3178_v28 = vpop.eup %1880  ;;  %v3194_v31 = vadd.f32 %v1873_v43, %v3058_v29 }
  0x9b   : > { %4420 = vst [vmem:[#allocation43_spill] sm:$0xff] %v3168_v3  ;;  %v706_v53 = vand.u32 2147483647, %v3121_v41  ;;  %v707_v44 = vand.u32 2147483647, %v3125_v38  ;;  %1896 = vpow2.f32 %v716_v42  ;;  %4423 = vst [vmem:[#allocation61_spill] sm:$0xff] %v3178_v28 }
  0x9c   : > { %v722_v46 = vmul.f32 1.442695, %v701_v17  ;;  %v708_v22 = vand.u32 2147483647, %v3137_v26  ;;  %v709_v35 = vand.u32 2147483647, %v3141_v62  ;;  %1898 = vpow2.f32 %v718_v15  ;;  %v3191_v62 = vpop.eup %1882 }
  0x9d   : > { %v724_v0 = vmul.f32 1.442695, %v702_v21  ;;  %v710_v41 = vand.u32 2147483647, %v3149_v19  ;;  %v711_v12 = vand.u32 2147483647, %v3153_v54  ;;  %1900 = vpow2.f32 %v720_v25  ;;  %v3207_v23 = vpop.eup %1884 }
  0x9e   : > { %v726_v38 = vmul.f32 1.442695, %v703_v36  ;;  %v3189_v26 = vld [vmem:[%s2378_s30 + $0x21] sm:$0x1]  ;;  %4424 = vst [vmem:[#allocation46_spill] sm:$0xff] %v3191_v62  ;;  %4425 = vst [vmem:[#allocation62_spill] sm:$0xff] %v3194_v31  ;;  %v3210_v19 = vadd.f32 %v1875_v51, %v3064_v2  ;;  %1902 = vpow2.f32 %v722_v46 }
  0x9f   : > { %v3196_v5 = vmul.f32 0.25, %v588_v11  ;;  %v728_v13 = vmul.f32 1.442695, %v704_v55  ;;  %v3199_v33 = vld [vmem:[%s2378_s30 + $0x31] sm:$0x1]  ;;  %4427 = vst [vmem:[#allocation72_spill] sm:$0xff] %v3207_v23  ;;  %1904 = vpow2.f32 %v724_v0  ;;  %v3226_v10 = vpop.eup %1886 }
  0xa0   : > { %v3205_v48 = vld [vmem:[%s2378_s30 + $0x51] sm:$0x1]  ;;  %4428 = vst [vmem:[#allocation73_spill] sm:$0xff] %v3210_v19  ;;  %v3212_v52 = vmul.f32 0.25, %v589_v45  ;;  %v730_v29 = vmul.f32 1.442695, %v705_v30  ;;  %1906 = vpow2.f32 %v726_v38  ;;  %v3234_v37 = vpop.eup %1888 }
  0xa1   : > { %4426 = vst [vmem:[#allocation63_spill] sm:$0xff] %v3196_v5  ;;  %v3215_v34 = vld [vmem:[%s2378_s30 + $0x61] sm:$0x1]  ;;  %v3218_v54 = vld [vmem:[%s2378_s30 + $0x71] sm:$0x1]  ;;  %4430 = vst [vmem:[#allocation75_spill] sm:$0xff] %v3226_v10  ;;  %1908 = vpow2.f32 %v728_v13 }
  0xa2   : > { %4429 = vst [vmem:[#allocation74_spill] sm:$0xff] %v3212_v52  ;;  %v732_v58 = vmul.f32 1.442695, %v706_v53  ;;  %v734_v18 = vmul.f32 1.442695, %v707_v44  ;;  %4431 = vst [vmem:[#allocation76_spill] sm:$0xff] %v3234_v37  ;;  %1910 = vpow2.f32 %v730_v29 }
  0xa3   : > { %v736_v7 = vmul.f32 1.442695, %v708_v22  ;;  %v3221_v9 = vld [vmem:[%s2378_s30 + $0x81] sm:$0x1]  ;;  %v3224_v2 = vld [vmem:[%s2378_s30 + $0x91] sm:$0x1]  ;;  %v3251_v16 = vpop.eup %1890 }
  0xa4   : > { %v738_v24 = vmul.f32 1.442695, %v709_v35  ;;  %v740_v59 = vmul.f32 1.442695, %v710_v41  ;;  %v742_v6 = vmul.f32 1.442695, %v711_v12  ;;  %1912 = vpow2.f32 %v732_v58 }
  0xa5   : > { %v3229_v17 = vld [vmem:[%s2378_s30 + $0xa1] sm:$0x1]  ;;  %v3232_v21 = vld [vmem:[%s2378_s30 + $0xb1] sm:$0x1]  ;;  %v776_v43 = vand.u32 2147483647, %v3183_v4  ;;  %1914 = vpow2.f32 %v734_v18 }
  0xa6   : > { %v3237_v36 = vld [vmem:[%s2378_s30 + $0xc1] sm:$0x1]  ;;  %v3240_v42 = vld [vmem:[%s2378_s30 + $0xd1] sm:$0x1]  ;;  %v777_v40 = vand.u32 2147483647, %v3186_v61  ;;  %1916 = vpow2.f32 %v736_v7 }
  0xa7   : > { %v778_v11 = vand.u32 2147483647, %v3189_v26  ;;  %v3246_v55 = vld [vmem:[%s2378_s30 + $0xe1] sm:$0x1]  ;;  %v779_v30 = vand.u32 2147483647, %v3199_v33  ;;  %v3265_v26 = vpop.eup %1892  ;;  %1918 = vpow2.f32 %v738_v24 }
  0xa8   : > { %v780_v15 = vand.u32 2147483647, %v3202_v57  ;;  %v781_v51 = vand.u32 2147483647, %v3205_v48  ;;  %4432 = vst [vmem:[#allocation77_spill] sm:$0xff] %v3251_v16  ;;  %v4433_v44 = vld [vmem:[#allocation22_spill] sm:$0xff]  ;;  %v3270_v29 = vpop.eup %1894  ;;  %1920 = vpow2.f32 %v740_v59 }
  0xa9   : > { %v3254_v45 = vld [vmem:[%s2378_s30 + $0xf1] sm:$0x1]  ;;  %v782_v25 = vand.u32 2147483647, %v3215_v34  ;;  %v783_v53 = vand.u32 2147483647, %v3218_v54  ;;  %v3274_v7 = vpop.eup %1896  ;;  %1922 = vpow2.f32 %v742_v6 }
  0xaa   : > { %v792_v46 = vand.u32 2147483647, %v4433_v44  ;;  %v784_v22 = vand.u32 2147483647, %v3221_v9  ;;  %v785_v35 = vand.u32 2147483647, %v3224_v2 }
  0xab   : > { %v4434_v0 = vld [vmem:[#allocation23_spill] sm:$0xff]  ;;  %v786_v12 = vand.u32 2147483647, %v3229_v17  ;;  %v787_v38 = vand.u32 2147483647, %v3232_v21  ;;  %v4435_v4 = vld [vmem:[#allocation24_spill] sm:$0xff]  ;;  %v3278_v21 = vpop.eup %1898 }
  0xac   : > { %v793_v41 = vand.u32 2147483647, %v4434_v0  ;;  %v794_v61 = vand.u32 2147483647, %v4435_v4  ;;  %v788_v13 = vand.u32 2147483647, %v3237_v36  ;;  %v808_v18 = vsub.f32 %v776_v43, %v792_v46  ;;  %v3283_v56 = vpop.eup %1900 }
  0xad   : > { %v789_v33 = vand.u32 2147483647, %v3240_v42  ;;  %v4436_v57 = vld [vmem:[#allocation25_spill] sm:$0xff]  ;;  %v790_v34 = vand.u32 2147483647, %v3246_v55  ;;  %v4437_v54 = vld [vmem:[#allocation26_spill] sm:$0xff]  ;;  %v3288_v20 = vpop.eup %1902 }
  0xae   : > { %v795_v48 = vand.u32 2147483647, %v4436_v57  ;;  %v796_v58 = vand.u32 2147483647, %v4437_v54  ;;  %v791_v9 = vand.u32 2147483647, %v3254_v45  ;;  %v809_v17 = vsub.f32 %v777_v40, %v793_v41  ;;  %v3292_v23 = vpop.eup %1904 }
  0xaf   : > { %v4438_v2 = vld [vmem:[#allocation27_spill] sm:$0xff]  ;;  %v4439_v36 = vld [vmem:[#allocation28_spill] sm:$0xff]  ;;  %v4440_v52 = vld [vmem:[#allocation30_spill] sm:$0xff]  ;;  %v810_v55 = vsub.f32 %v778_v11, %v794_v61  ;;  %v824_v47 = vand.u32 2147483647, %v808_v18  ;;  %v3296_v32 = vpop.eup %1906 }
  0xb0   : > { %v797_v24 = vand.u32 2147483647, %v4438_v2  ;;  %v798_v42 = vand.u32 2147483647, %v4439_v36  ;;  %v799_v5 = vand.u32 2147483647, %v4440_v52  ;;  %v811_v16 = vsub.f32 %v779_v30, %v795_v48  ;;  %v3298_v27 = vpop.eup %1908 }
  0xb1   : > { %v4441_v59 = vld [vmem:[#allocation31_spill] sm:$0xff]  ;;  %v4442_v43 = vld [vmem:[#allocation32_spill] sm:$0xff]  ;;  %v4443_v49 = vld [vmem:[#allocation34_spill] sm:$0xff]  ;;  %v812_v10 = vsub.f32 %v780_v15, %v796_v58  ;;  %v807_v62 = vand.u32 2147483647, %v4448_v8  ;;  %v3300_v18 = vpop.eup %1910 }
  0xb2   : > { %v800_v3 = vand.u32 2147483647, %v4441_v59  ;;  %v801_v46 = vand.u32 2147483647, %v4442_v43  ;;  %v802_v6 = vand.u32 2147483647, %v4443_v49  ;;  %v813_v39 = vsub.f32 %v781_v51, %v797_v24 }
  0xb3   : > { %v4444_v63 = vld [vmem:[#allocation35_spill] sm:$0xff]  ;;  %v4445_v40 = vld [vmem:[#allocation36_spill] sm:$0xff]  ;;  %v4446_v37 = vld [vmem:[#allocation37_spill] sm:$0xff]  ;;  %v825_v28 = vand.u32 2147483647, %v809_v17  ;;  %v814_v19 = vsub.f32 %v782_v25, %v798_v42  ;;  %v815_v30 = vsub.f32 %v783_v53, %v799_v5  ;;  %v3304_v17 = vpop.eup %1912 }
  0xb4   : > { %v803_v45 = vand.u32 2147483647, %v4444_v63  ;;  %v804_v41 = vand.u32 2147483647, %v4445_v40  ;;  %v805_v1 = vand.u32 2147483647, %v4446_v37  ;;  %v816_v48 = vsub.f32 %v784_v22, %v800_v3  ;;  %v3306_v22 = vpop.eup %1914 }
  0xb5   : > { %v4447_v11 = vld [vmem:[#allocation38_spill] sm:$0xff]  ;;  %v826_v14 = vand.u32 2147483647, %v810_v55  ;;  %v817_v31 = vsub.f32 %v785_v35, %v801_v46  ;;  %v818_v50 = vsub.f32 %v786_v12, %v802_v6  ;;  %v827_v58 = vand.u32 2147483647, %v811_v16  ;;  %v4464_v54 = vld [vmem:[#allocation45_spill] sm:$0xff] }
  0xb6   : > { %v806_v61 = vand.u32 2147483647, %v4447_v11  ;;  %v819_v15 = vsub.f32 %v787_v38, %v803_v45  ;;  %v820_v11 = vsub.f32 %v788_v13, %v804_v41  ;;  %v3302_v37 = vsub.f32 %v789_v33, %v805_v1  ;;  %v3309_v38 = vld [vmem:[%s2378_s30 + $0xe8] sm:$0x1]  ;;  %v4450_v13 = vld [vmem:[#allocation29_spill] sm:$0xff] }
  0xb7   : > { %v828_v51 = vand.u32 2147483647, %v812_v10  ;;  %v840_v24 = vmul.f32 1.442695, %v824_v47  ;;  %v823_v3 = vsub.f32 %v791_v9, %v807_v62  ;;  %v829_v25 = vand.u32 2147483647, %v813_v39  ;;  %v3315_v47 = vpop.eup %1916 }
  0xb8   : > { %v822_v5 = vsub.f32 %v790_v34, %v806_v61  ;;  %v842_v53 = vmul.f32 1.442695, %v825_v28  ;;  %v830_v35 = vand.u32 2147483647, %v814_v19  ;;  %v831_v12 = vand.u32 2147483647, %v815_v30  ;;  %v3324_v19 = vpop.eup %1918 }
  0xb9   : > { %v844_v16 = vmul.f32 1.442695, %v826_v14  ;;  %4449 = vst [vmem:[#allocation78_spill] sm:$0xff] %v3309_v38  ;;  %v3313_v1 = vadd.f32 %v3309_v38, %v4450_v13  ;;  %v832_v10 = vand.u32 2147483647, %v816_v48  ;;  %v4452_v39 = vld [vmem:[#allocation33_spill] sm:$0xff]  ;;  %1924 = vpow2.f32 %v840_v24 }
  0xba   : > { %v833_v33 = vand.u32 2147483647, %v817_v31  ;;  %v846_v34 = vmul.f32 1.442695, %v827_v58  ;;  %v3318_v62 = vld [vmem:[%s2378_s30 + $0xf8] sm:$0x1]  ;;  %v3330_v31 = vpop.eup %1920  ;;  %1926 = vpow2.f32 %v842_v53 }
  0xbb   : > { %4451 = vst [vmem:[#allocation29_spill] sm:$0xff] %v3318_v62  ;;  %v3322_v28 = vadd.f32 %v3318_v62, %v4452_v39  ;;  %v834_v14 = vand.u32 2147483647, %v818_v50  ;;  %v848_v9 = vmul.f32 1.442695, %v828_v51  ;;  %v4453_v55 = vld [vmem:[#allocation6_spill] sm:$0xff]  ;;  %v3333_v50 = vpop.eup %1922  ;;  %1928 = vpow2.f32 %v844_v16 }
  0xbc   : > { %v2118_v42 = vld [vmem:[%s2378_s30 + $0x8] sm:$0x1]  ;;  %v835_v6 = vand.u32 2147483647, %v819_v15  ;;  %v836_v45 = vand.u32 2147483647, %v820_v11  ;;  %1930 = vpow2.f32 %v846_v34 }
  0xbd   : > { %v3328_v46 = vadd.f32 %v2118_v42, %v4453_v55  ;;  %v837_v41 = vand.u32 2147483647, %v3302_v37  ;;  %v838_v61 = vand.u32 2147483647, %v822_v5  ;;  %v839_v30 = vand.u32 2147483647, %v823_v3 }
  0xbe   : > { %v850_v48 = vmul.f32 1.442695, %v829_v25  ;;  %v3336_v58 = vld [vmem:[%s2378_s30 + $0x2] sm:$0x1]  ;;  %v3339_v51 = vld [vmem:[%s2378_s30 + $0x12] sm:$0x1]  ;;  %1932 = vpow2.f32 %v848_v9 }
  0xbf   : > { %4454 = vst [vmem:[#allocation33_spill] sm:$0xff] %v3328_v46  ;;  %v3342_v15 = vld [vmem:[%s2378_s30 + $0x22] sm:$0x1]  ;;  %v852_v11 = vmul.f32 1.442695, %v830_v35  ;;  %v4455_v25 = vld [vmem:[#allocation7_spill] sm:$0xff] }
  0xc0   : > { %v3345_v37 = vld [vmem:[%s2378_s30 + $0x32] sm:$0x1]  ;;  %v3348_v24 = vld [vmem:[%s2378_s30 + $0x42] sm:$0x1]  ;;  %v2119_v3 = vld [vmem:[%s2378_s30 + $0x18] sm:$0x1]  ;;  %1934 = vpow2.f32 %v850_v48 }
  0xc1   : > { %v3351_v5 = vld [vmem:[%s2378_s30 + $0x52] sm:$0x1]  ;;  %v3355_v53 = vadd.f32 %v2119_v3, %v4455_v25  ;;  %v2120_v16 = vld [vmem:[%s2378_s30 + $0x28] sm:$0x1]  ;;  %v854_v35 = vmul.f32 1.442695, %v831_v12  ;;  %1936 = vpow2.f32 %v852_v11 }
  0xc2   : > { %v4457_v13 = vld [vmem:[#allocation8_spill] sm:$0xff]  ;;  %v856_v34 = vmul.f32 1.442695, %v832_v10  ;;  %v858_v42 = vmul.f32 1.442695, %v833_v33  ;;  %v4459_v33 = vld [vmem:[#allocation9_spill] sm:$0xff] }
  0xc3   : > { %4456 = vst [vmem:[#allocation6_spill] sm:$0xff] %v3355_v53  ;;  %v3359_v39 = vadd.f32 %v2120_v16, %v4457_v13  ;;  %v3362_v55 = vld [vmem:[%s2378_s30 + $0x62] sm:$0x1]  ;;  %v3365_v8 = vld [vmem:[%s2378_s30 + $0x72] sm:$0x1]  ;;  %1938 = vpow2.f32 %v854_v35 }
  0xc4   : > { %v3368_v40 = vld [vmem:[%s2378_s30 + $0x82] sm:$0x1]  ;;  %v860_v3 = vmul.f32 1.442695, %v834_v14  ;;  %v862_v25 = vmul.f32 1.442695, %v835_v6  ;;  %1940 = vpow2.f32 %v856_v34 }
  0xc5   : > { %4458 = vst [vmem:[#allocation7_spill] sm:$0xff] %v3359_v39  ;;  %v864_v63 = vmul.f32 1.442695, %v836_v45  ;;  %v3371_v49 = vld [vmem:[%s2378_s30 + $0x92] sm:$0x1]  ;;  %1942 = vpow2.f32 %v858_v42  ;;  %v4468_v0 = vld [vmem:[#allocation50_spill] sm:$0xff] }
  0xc6   : > { %v3374_v16 = vld [vmem:[%s2378_s30 + $0xa2] sm:$0x1]  ;;  %v3377_v12 = vld [vmem:[%s2378_s30 + $0xb2] sm:$0x1]  ;;  %v2121_v10 = vld [vmem:[%s2378_s30 + $0x38] sm:$0x1]  ;;  %1944 = vpow2.f32 %v860_v3 }
  0xc7   : > { %v3381_v9 = vadd.f32 %v2121_v10, %v4459_v33  ;;  %v866_v13 = vmul.f32 1.442695, %v837_v41  ;;  %v868_v43 = vmul.f32 1.442695, %v838_v61  ;;  %v870_v59 = vmul.f32 1.442695, %v839_v30 }
  0xc8   : > { %v3384_v52 = vld [vmem:[%s2378_s30 + $0xc2] sm:$0x1]  ;;  %v3387_v14 = vld [vmem:[%s2378_s30 + $0xd2] sm:$0x1]  ;;  %v920_v36 = vand.u32 2147483647, %v3336_v58  ;;  %1946 = vpow2.f32 %v862_v25 }
  0xc9   : > { %4460 = vst [vmem:[#allocation8_spill] sm:$0xff] %v3381_v9  ;;  %v3390_v6 = vld [vmem:[%s2378_s30 + $0xe2] sm:$0x1]  ;;  %v3393_v45 = vld [vmem:[%s2378_s30 + $0xf2] sm:$0x1]  ;;  %1948 = vpow2.f32 %v864_v63  ;;  %v4465_v3 = vld [vmem:[#allocation47_spill] sm:$0xff] }
  0xca   : > { %v921_v2 = vand.u32 2147483647, %v3339_v51  ;;  %v922_v10 = vand.u32 2147483647, %v3342_v15  ;;  %v923_v41 = vand.u32 2147483647, %v3345_v37  ;;  %1950 = vpow2.f32 %v866_v13 }
  0xcb   : > { %v924_v61 = vand.u32 2147483647, %v3348_v24  ;;  %v925_v30 = vand.u32 2147483647, %v3351_v5  ;;  %v926_v48 = vand.u32 2147483647, %v3362_v55  ;;  %v1925_v55 = vpop.eup %1924  ;;  %1952 = vpow2.f32 %v868_v43 }
  0xcc   : > { %v927_v11 = vand.u32 2147483647, %v3365_v8  ;;  %v928_v33 = vand.u32 2147483647, %v3368_v40  ;;  %v929_v58 = vand.u32 2147483647, %v3371_v49  ;;  %1954 = vpow2.f32 %v870_v59 }
  0xcd   : > { %v930_v51 = vand.u32 2147483647, %v3374_v16  ;;  %v931_v15 = vand.u32 2147483647, %v3377_v12  ;;  %v932_v37 = vand.u32 2147483647, %v3384_v52  ;;  %v1927_v52 = vpop.eup %1926 }
  0xce   : > { %v933_v24 = vand.u32 2147483647, %v3387_v14  ;;  %v934_v5 = vand.u32 2147483647, %v3390_v6  ;;  %v935_v35 = vand.u32 2147483647, %v3393_v45  ;;  %v1929_v44 = vpop.eup %1928 }
  0xcf   : > { %v4461_v8 = vld [vmem:[#allocation41_spill] sm:$0xff]  ;;  %v4462_v40 = vld [vmem:[#allocation42_spill] sm:$0xff]  ;;  %v4463_v49 = vld [vmem:[#allocation44_spill] sm:$0xff]  ;;  %v939_v12 = vand.u32 2147483647, %v4464_v54  ;;  %v1931_v53 = vpop.eup %1930 }
  0xd0   : > { %v936_v34 = vand.u32 2147483647, %v4461_v8  ;;  %v937_v42 = vand.u32 2147483647, %v4462_v40  ;;  %v938_v16 = vand.u32 2147483647, %v4463_v49  ;;  %v1933_v60 = vpop.eup %1932 }
  0xd1   : > { %v940_v57 = vand.u32 2147483647, %v4465_v3  ;;  %v4466_v14 = vld [vmem:[#allocation48_spill] sm:$0xff]  ;;  %v4467_v6 = vld [vmem:[#allocation49_spill] sm:$0xff]  ;;  %v943_v45 = vand.u32 2147483647, %v4468_v0 }
  0xd2   : > { %v941_v4 = vand.u32 2147483647, %v4466_v14  ;;  %v942_v25 = vand.u32 2147483647, %v4467_v6  ;;  %v4469_v8 = vld [vmem:[#allocation51_spill] sm:$0xff]  ;;  %v4470_v9 = vld [vmem:[#allocation52_spill] sm:$0xff]  ;;  %v952_v14 = vsub.f32 %v920_v36, %v936_v34  ;;  %v3426_v6 = vadd.f32 %v1925_v55, %v3265_v26 }
  0xd3   : > { %v944_v40 = vand.u32 2147483647, %v4469_v8  ;;  %v945_v63 = vand.u32 2147483647, %v4470_v9  ;;  %v4471_v39 = vld [vmem:[#allocation53_spill] sm:$0xff]  ;;  %v4472_v54 = vld [vmem:[#allocation54_spill] sm:$0xff]  ;;  %v953_v8 = vsub.f32 %v921_v2, %v937_v42  ;;  %v3434_v9 = vadd.f32 %v1929_v44, %v3274_v7 }
  0xd4   : > { %v946_v49 = vand.u32 2147483647, %v4471_v39  ;;  %v947_v46 = vand.u32 2147483647, %v4472_v54  ;;  %v4473_v3 = vld [vmem:[#allocation55_spill] sm:$0xff]  ;;  %v4474_v13 = vld [vmem:[#allocation56_spill] sm:$0xff]  ;;  %v3431_v39 = vadd.f32 %v1927_v52, %v3270_v29  ;;  %v954_v54 = vsub.f32 %v922_v10, %v938_v16 }
  0xd5   : > { %v948_v62 = vand.u32 2147483647, %v4473_v3  ;;  %v949_v38 = vand.u32 2147483647, %v4474_v13  ;;  %v950_v0 = vand.u32 2147483647, %v3313_v1  ;;  %v1935_v3 = vpop.eup %1934  ;;  %v3437_v36 = vadd.f32 %v1931_v53, %v3278_v21 }
  0xd6   : > { %v951_v43 = vand.u32 2147483647, %v3322_v28  ;;  %v955_v34 = vsub.f32 %v923_v41, %v939_v12  ;;  %v956_v26 = vsub.f32 %v924_v61, %v940_v57  ;;  %v957_v55 = vsub.f32 %v925_v30, %v941_v4  ;;  %v1937_v13 = vpop.eup %1936 }
  0xd7   : > { %v3440_v1 = vadd.f32 %v1933_v60, %v3283_v56  ;;  %v958_v2 = vsub.f32 %v926_v48, %v942_v25  ;;  %v959_v59 = vsub.f32 %v927_v11, %v943_v45  ;;  %v968_v28 = vand.u32 2147483647, %v952_v14  ;;  %v1939_v29 = vpop.eup %1938 }
  0xd8   : > { %v960_v42 = vsub.f32 %v928_v33, %v944_v40  ;;  %v961_v52 = vsub.f32 %v929_v58, %v945_v63  ;;  %v962_v44 = vsub.f32 %v930_v51, %v946_v49  ;;  %v969_v7 = vand.u32 2147483647, %v953_v8  ;;  %v1941_v10 = vpop.eup %1940 }
  0xd9   : > { %v3443_v16 = vadd.f32 %v1935_v3, %v3288_v20  ;;  %v963_v21 = vsub.f32 %v931_v15, %v947_v46  ;;  %v964_v53 = vsub.f32 %v932_v37, %v948_v62  ;;  %v970_v57 = vand.u32 2147483647, %v954_v54  ;;  %v1943_v4 = vpop.eup %1942 }
  0xda   : > { %v3446_v41 = vadd.f32 %v1937_v13, %v3292_v23  ;;  %v965_v60 = vsub.f32 %v933_v24, %v949_v38  ;;  %v966_v56 = vsub.f32 %v934_v5, %v950_v0  ;;  %v971_v61 = vand.u32 2147483647, %v955_v34  ;;  %v1945_v30 = vpop.eup %1944 }
  0xdb   : > { %v3449_v48 = vadd.f32 %v1939_v29, %v3296_v32  ;;  %v967_v11 = vsub.f32 %v935_v35, %v951_v43  ;;  %v972_v33 = vand.u32 2147483647, %v956_v26  ;;  %v984_v58 = vmul.f32 1.442695, %v968_v28  ;;  %v1947_v51 = vpop.eup %1946 }
  0xdc   : > { %v3452_v20 = vadd.f32 %v1941_v10, %v3298_v27  ;;  %v973_v62 = vand.u32 2147483647, %v957_v55  ;;  %v974_v46 = vand.u32 2147483647, %v958_v2  ;;  %v986_v15 = vmul.f32 1.442695, %v969_v7  ;;  %v1949_v37 = vpop.eup %1948 }
  0xdd   : > { %v3455_v23 = vadd.f32 %v1943_v4, %v3300_v18  ;;  %v975_v38 = vand.u32 2147483647, %v959_v59  ;;  %v976_v24 = vand.u32 2147483647, %v960_v42  ;;  %v988_v5 = vmul.f32 1.442695, %v970_v57  ;;  %v1951_v12 = vpop.eup %1950 }
  0xde   : > { %v3458_v32 = vadd.f32 %v1945_v30, %v3304_v17  ;;  %v977_v35 = vand.u32 2147483647, %v961_v52  ;;  %v978_v25 = vand.u32 2147483647, %v962_v44  ;;  %v990_v45 = vmul.f32 1.442695, %v971_v61  ;;  %v1953_v40 = vpop.eup %1952 }
  0xdf   : > { %v979_v27 = vand.u32 2147483647, %v963_v21  ;;  %v980_v63 = vand.u32 2147483647, %v964_v53  ;;  %1956 = vpow2.f32 %v984_v58  ;;  %v992_v49 = vmul.f32 1.442695, %v972_v33  ;;  %v1955_v54 = vpop.eup %1954 }
  0xe0   : > { %4475 = vst [vmem:[#allocation9_spill] sm:$0xff] %v3458_v32  ;;  %v3461_v14 = vadd.f32 %v1947_v51, %v3306_v22  ;;  %v981_v18 = vand.u32 2147483647, %v965_v60  ;;  %1958 = vpow2.f32 %v986_v15  ;;  %v994_v0 = vmul.f32 1.442695, %v973_v62  ;;  %v4482_v57 = vld [vmem:[#allocation11_spill] sm:$0xff] }
  0xe1   : > { %v3464_v43 = vadd.f32 %v1949_v37, %v3315_v47  ;;  %v982_v8 = vand.u32 2147483647, %v966_v56  ;;  %v983_v17 = vand.u32 2147483647, %v967_v11  ;;  %1960 = vpow2.f32 %v988_v5  ;;  %v3473_v59 = vld [vmem:[%s2378_s30 + $0x3] sm:$0x1] }
  0xe2   : > { %4476 = vst [vmem:[#allocation41_spill] sm:$0xff] %v3461_v14  ;;  %v3467_v3 = vadd.f32 %v1951_v12, %v3324_v19  ;;  %v3470_v34 = vadd.f32 %v1953_v40, %v3330_v31  ;;  %1962 = vpow2.f32 %v990_v45  ;;  %v996_v22 = vmul.f32 1.442695, %v974_v46  ;;  %v3483_v52 = vld [vmem:[%s2378_s30 + $0x13] sm:$0x1]  ;;  %v4485_v51 = vld [vmem:[#allocation13_spill] sm:$0xff] }
  0xe3   : > { %4477 = vst [vmem:[#allocation42_spill] sm:$0xff] %v3464_v43  ;;  %1964 = vpow2.f32 %v992_v49  ;;  %v998_v26 = vmul.f32 1.442695, %v975_v38  ;;  %v1000_v47 = vmul.f32 1.442695, %v976_v24  ;;  %v3476_v31 = vadd.f32 %v1955_v54, %v3333_v50  ;;  %v4481_v50 = vld [vmem:[#allocation10_spill] sm:$0xff] }
  0xe4   : > { %4478 = vst [vmem:[#allocation44_spill] sm:$0xff] %v3467_v3  ;;  %4479 = vst [vmem:[#allocation45_spill] sm:$0xff] %v3470_v34  ;;  %v1002_v55 = vmul.f32 1.442695, %v977_v35  ;;  %1966 = vpow2.f32 %v994_v0  ;;  %v1004_v13 = vmul.f32 1.442695, %v978_v25 }
  0xe5   : > { %v1006_v2 = vmul.f32 1.442695, %v979_v27  ;;  %v1008_v19 = vmul.f32 1.442695, %v980_v63  ;;  %4480 = vst [vmem:[#allocation47_spill] sm:$0xff] %v3476_v31  ;;  %1968 = vpow2.f32 %v996_v22  ;;  %v4483_v56 = vld [vmem:[#allocation12_spill] sm:$0xff] }
  0xe6   : > { %v1010_v28 = vmul.f32 1.442695, %v981_v18  ;;  %v3478_v29 = vmul.f32 1.442695, %v982_v8  ;;  %v3480_v42 = vmul.f32 1.442695, %v983_v17  ;;  %1970 = vpow2.f32 %v998_v26 }
  0xe7   : > { %v3486_v44 = vld [vmem:[%s2378_s30 + $0x23] sm:$0x1]  ;;  %v3489_v7 = vld [vmem:[%s2378_s30 + $0x33] sm:$0x1]  ;;  %v2122_v10 = vld [vmem:[%s2378_s30 + $0x48] sm:$0x1]  ;;  %1972 = vpow2.f32 %v1000_v47 }
  0xe8   : > { %v3493_v21 = vadd.f32 %v2122_v10, %v4481_v50  ;;  %v2123_v53 = vld [vmem:[%s2378_s30 + $0x58] sm:$0x1]  ;;  %v2124_v60 = vld [vmem:[%s2378_s30 + $0x68] sm:$0x1]  ;;  %v3504_v30 = vld [vmem:[%s2378_s30 + $0x43] sm:$0x1]  ;;  %1974 = vpow2.f32 %v1002_v55 }
  0xe9   : > { %v3497_v4 = vadd.f32 %v2123_v53, %v4482_v57  ;;  %v3501_v61 = vadd.f32 %v2124_v60, %v4483_v56  ;;  %v3507_v11 = vld [vmem:[%s2378_s30 + $0x53] sm:$0x1]  ;;  %v3510_v33 = vld [vmem:[%s2378_s30 + $0x63] sm:$0x1]  ;;  %v2125_v58 = vld [vmem:[%s2378_s30 + $0x78] sm:$0x1]  ;;  %1976 = vpow2.f32 %v1004_v13 }
  0xea   : > { %v3514_v62 = vadd.f32 %v2125_v58, %v4485_v51  ;;  %v2126_v46 = vld [vmem:[%s2378_s30 + $0x88] sm:$0x1]  ;;  %v2127_v38 = vld [vmem:[%s2378_s30 + $0x98] sm:$0x1]  ;;  %v4489_v24 = vld [vmem:[#allocation15_spill] sm:$0xff]  ;;  %1978 = vpow2.f32 %v1006_v2 }
  0xeb   : > { %4484 = vst [vmem:[#allocation48_spill] sm:$0xff] %v3501_v61  ;;  %v4487_v15 = vld [vmem:[#allocation14_spill] sm:$0xff]  ;;  %v3522_v5 = vadd.f32 %v2127_v38, %v4489_v24  ;;  %v4491_v35 = vld [vmem:[#allocation16_spill] sm:$0xff]  ;;  %v4493_v49 = vld [vmem:[#allocation17_spill] sm:$0xff]  ;;  %v1066_v47 = vand.u32 2147483647, %v3486_v44  ;;  %1980 = vpow2.f32 %v1008_v19 }
  0xec   : > { %4486 = vst [vmem:[#allocation49_spill] sm:$0xff] %v3514_v62  ;;  %v3518_v37 = vadd.f32 %v2126_v46, %v4487_v15  ;;  %v2128_v12 = vld [vmem:[%s2378_s30 + $0xa8] sm:$0x1]  ;;  %v3529_v45 = vld [vmem:[%s2378_s30 + $0x73] sm:$0x1]  ;;  %v4497_v22 = vld [vmem:[#allocation19_spill] sm:$0xff]  ;;  %1982 = vpow2.f32 %v1010_v28 }
  0xed   : > { %4490 = vst [vmem:[#allocation51_spill] sm:$0xff] %v3522_v5  ;;  %v3526_v25 = vadd.f32 %v2128_v12, %v4491_v35  ;;  %v3532_v40 = vld [vmem:[%s2378_s30 + $0x83] sm:$0x1]  ;;  %v3535_v27 = vld [vmem:[%s2378_s30 + $0x93] sm:$0x1]  ;;  %v4502_v58 = vld [vmem:[#allocation21_spill] sm:$0xff]  ;;  %1984 = vpow2.f32 %v3478_v29 }
  0xee   : > { %4488 = vst [vmem:[#allocation50_spill] sm:$0xff] %v3518_v37  ;;  %v2129_v63 = vld [vmem:[%s2378_s30 + $0xb8] sm:$0x1]  ;;  %v2130_v0 = vld [vmem:[%s2378_s30 + $0xc8] sm:$0x1]  ;;  %v4503_v51 = vld [vmem:[#allocation29_spill] sm:$0xff]  ;;  %1986 = vpow2.f32 %v3480_v42 }
  0xef   : > { %4492 = vst [vmem:[#allocation52_spill] sm:$0xff] %v3526_v25  ;;  %v3539_v18 = vadd.f32 %v2129_v63, %v4493_v49  ;;  %v4495_v8 = vld [vmem:[#allocation18_spill] sm:$0xff]  ;;  %v2131_v54 = vld [vmem:[%s2378_s30 + $0xd8] sm:$0x1]  ;;  %v3553_v53 = vld [vmem:[%s2378_s30 + $0xb3] sm:$0x1]  ;;  %v3564_v46 = vadd.f32 %v4503_v51, %v4502_v58 }
  0xf0   : > { %v3543_v17 = vadd.f32 %v2130_v0, %v4495_v8  ;;  %v3547_v10 = vadd.f32 %v2131_v54, %v4497_v22  ;;  %v3550_v50 = vld [vmem:[%s2378_s30 + $0xa3] sm:$0x1]  ;;  %v4499_v26 = vld [vmem:[#allocation20_spill] sm:$0xff]  ;;  %v1064_v12 = vand.u32 2147483647, %v3473_v59  ;;  %v1957_v54 = vpop.eup %1956  ;;  %v4506_v19 = vld [vmem:[#allocation33_spill] sm:$0xff] }
  0xf1   : > { %4494 = vst [vmem:[#allocation53_spill] sm:$0xff] %v3539_v18  ;;  %v3556_v57 = vld [vmem:[%s2378_s30 + $0xc3] sm:$0x1]  ;;  %4504 = vst [vmem:[#allocation10_spill] sm:$0xff] %v3564_v46  ;;  %v3567_v15 = vld [vmem:[%s2378_s30 + $0xd3] sm:$0x1] }
  0xf2   : > { %4496 = vst [vmem:[#allocation54_spill] sm:$0xff] %v3543_v17  ;;  %4498 = vst [vmem:[#allocation55_spill] sm:$0xff] %v3547_v10  ;;  %v4500_v60 = vld [vmem:[#allocation78_spill] sm:$0xff]  ;;  %v3573_v24 = vld [vmem:[%s2378_s30 + $0xf3] sm:$0x1] }
  0xf3   : > { %v3560_v56 = vadd.f32 %v4500_v60, %v4499_v26  ;;  %v3570_v38 = vld [vmem:[%s2378_s30 + $0xe3] sm:$0x1]  ;;  %v1065_v35 = vand.u32 2147483647, %v3483_v52  ;;  %v1067_v63 = vand.u32 2147483647, %v3489_v7  ;;  %v1959_v52 = vpop.eup %1958 }
  0xf4   : > { %v1068_v49 = vand.u32 2147483647, %v3504_v30  ;;  %v1069_v0 = vand.u32 2147483647, %v3507_v11  ;;  %v1070_v8 = vand.u32 2147483647, %v3510_v33  ;;  %v1961_v30 = vpop.eup %1960  ;;  %v3599_v28 = vadd.f32 %v1959_v52, %v3431_v39 }
  0xf5   : > { %4501 = vst [vmem:[#allocation56_spill] sm:$0xff] %v3560_v56  ;;  %v1071_v22 = vand.u32 2147483647, %v3529_v45  ;;  %v1072_v59 = vand.u32 2147483647, %v3532_v40  ;;  %v1963_v45 = vpop.eup %1962  ;;  %v3593_v40 = vadd.f32 %v1957_v54, %v3426_v6  ;;  %v4510_v58 = vld [vmem:[#allocation8_spill] sm:$0xff]  ;;  %v3604_v29 = vadd.f32 %v1961_v30, %v3434_v9 }
  0xf6   : > { %v1073_v55 = vand.u32 2147483647, %v3535_v27  ;;  %v1074_v44 = vand.u32 2147483647, %v3550_v50  ;;  %v1075_v13 = vand.u32 2147483647, %v3553_v53  ;;  %v1965_v26 = vpop.eup %1964  ;;  %v3610_v54 = vadd.f32 %v1963_v45, %v3437_v36 }
  0xf7   : > { %v1076_v7 = vand.u32 2147483647, %v3556_v57  ;;  %v1077_v11 = vand.u32 2147483647, %v3567_v15  ;;  %v1078_v2 = vand.u32 2147483647, %v3570_v38  ;;  %v1967_v15 = vpop.eup %1966  ;;  %v3616_v34 = vadd.f32 %v1965_v26, %v3440_v1 }
  0xf8   : > { %v1079_v33 = vand.u32 2147483647, %v3573_v24  ;;  %4505 = vst [vmem:[#allocation11_spill] sm:$0xff] %v3593_v40  ;;  %v1080_v27 = vand.u32 2147483647, %v4506_v19  ;;  %v4507_v50 = vld [vmem:[#allocation6_spill] sm:$0xff]  ;;  %v1969_v31 = vpop.eup %1968 }
  0xf9   : > { %v1081_v53 = vand.u32 2147483647, %v4507_v50  ;;  %4508 = vst [vmem:[#allocation12_spill] sm:$0xff] %v3599_v28  ;;  %v4509_v57 = vld [vmem:[#allocation7_spill] sm:$0xff]  ;;  %v1083_v51 = vand.u32 2147483647, %v4510_v58  ;;  %v1971_v43 = vpop.eup %1970  ;;  %v3628_v14 = vadd.f32 %v1969_v31, %v3446_v41 }
  0xfa   : > { %v1082_v60 = vand.u32 2147483647, %v4509_v57  ;;  %4511 = vst [vmem:[#allocation13_spill] sm:$0xff] %v3604_v29  ;;  %v1084_v6 = vand.u32 2147483647, %v3493_v21  ;;  %4512 = vst [vmem:[#allocation14_spill] sm:$0xff] %v3610_v54  ;;  %v3622_v29 = vadd.f32 %v1967_v15, %v3443_v16  ;;  %v1096_v54 = vsub.f32 %v1064_v12, %v1080_v27 }
  0xfb   : > { %v1085_v38 = vand.u32 2147483647, %v3497_v4  ;;  %v1086_v24 = vand.u32 2147483647, %v3501_v61  ;;  %v1087_v39 = vand.u32 2147483647, %v3514_v62  ;;  %v1097_v40 = vsub.f32 %v1065_v35, %v1081_v53 }
  0xfc   : > { %v1088_v42 = vand.u32 2147483647, %v3518_v37  ;;  %v1089_v52 = vand.u32 2147483647, %v3522_v5  ;;  %4513 = vst [vmem:[#allocation15_spill] sm:$0xff] %v3616_v34  ;;  %4514 = vst [vmem:[#allocation16_spill] sm:$0xff] %v3622_v29  ;;  %v1098_v1 = vsub.f32 %v1066_v47, %v1082_v60  ;;  %v1099_v26 = vsub.f32 %v1067_v63, %v1083_v51  ;;  %v1973_v34 = vpop.eup %1972 }
  0xfd   : > { %v1090_v9 = vand.u32 2147483647, %v3526_v25  ;;  %v1091_v30 = vand.u32 2147483647, %v3539_v18  ;;  %v1092_v3 = vand.u32 2147483647, %v3543_v17  ;;  %v1100_v32 = vsub.f32 %v1068_v49, %v1084_v6  ;;  %v1975_v16 = vpop.eup %1974 }
  0xfe   : > { %v1093_v36 = vand.u32 2147483647, %v3547_v10  ;;  %v1094_v45 = vand.u32 2147483647, %v3560_v56  ;;  %v1095_v28 = vand.u32 2147483647, %v3564_v46  ;;  %v1101_v17 = vsub.f32 %v1069_v0, %v1085_v38  ;;  %v3630_v56 = vpop.eup %1976 }
  0xff   : > { %4515 = vst [vmem:[#allocation17_spill] sm:$0xff] %v3628_v14  ;;  %v1102_v18 = vsub.f32 %v1070_v8, %v1086_v24  ;;  %v1103_v15 = vsub.f32 %v1071_v22, %v1087_v39  ;;  %v1104_v29 = vsub.f32 %v1072_v59, %v1088_v42  ;;  %v1105_v10 = vsub.f32 %v1073_v55, %v1089_v52  ;;  %v3632_v47 = vpop.eup %1978  ;;  %v4525_v6 = vld [vmem:[#allocation22_spill] sm:$0xff]  ;;  %v3659_v24 = vld [vmem:[%s2378_s30 + $0x19] sm:$0x1] }
 0x100   : > { %v1106_v25 = vsub.f32 %v1074_v44, %v1090_v9  ;;  %4516 = vst [vmem:[#allocation18_spill] sm:$0xff] %v3630_v56  ;;  %v1107_v12 = vsub.f32 %v1075_v13, %v1091_v30  ;;  %v1108_v27 = vsub.f32 %v1076_v7, %v1092_v3  ;;  %v1109_v46 = vsub.f32 %v1077_v11, %v1093_v36  ;;  %v3634_v49 = vpop.eup %1980  ;;  %v3788_v14 = vld [vmem:[%s2378_s30 + $0xc9] sm:$0x1]  ;;  %v3826_v62 = vld [vmem:[%s2378_s30 + $0xf9] sm:$0x1] }
 0x101   : > { %v1112_v35 = vand.u32 2147483647, %v1096_v54  ;;  %4517 = vst [vmem:[#allocation19_spill] sm:$0xff] %v3632_v47  ;;  %v1110_v63 = vsub.f32 %v1078_v2, %v1094_v45  ;;  %v1113_v53 = vand.u32 2147483647, %v1097_v40  ;;  %4518 = vst [vmem:[#allocation20_spill] sm:$0xff] %v3634_v49  ;;  %v1111_v0 = vsub.f32 %v1079_v33, %v1095_v28  ;;  %v3636_v55 = vpop.eup %1982 }
 0x102   : > { %v1114_v41 = vand.u32 2147483647, %v1098_v1  ;;  %v1115_v31 = vand.u32 2147483647, %v1099_v26  ;;  %v1116_v8 = vand.u32 2147483647, %v1100_v32  ;;  %v3639_v44 = vadd.f32 %v1971_v43, %v3449_v48  ;;  %v3641_v11 = vpop.eup %1984 }
 0x103   : > { %v1117_v22 = vand.u32 2147483647, %v1101_v17  ;;  %v1118_v59 = vand.u32 2147483647, %v1102_v18  ;;  %4519 = vst [vmem:[#allocation78_spill] sm:$0xff] %v3636_v55  ;;  %4521 = vst [vmem:[#allocation29_spill] sm:$0xff] %v3641_v11  ;;  %v3644_v2 = vadd.f32 %v1973_v34, %v3452_v20  ;;  %v3646_v17 = vpop.eup %1986  ;;  %v3649_v18 = vadd.f32 %v1975_v16, %v3455_v23 }
 0x104   : > { %4520 = vst [vmem:[#allocation21_spill] sm:$0xff] %v3639_v44  ;;  %v1119_v3 = vand.u32 2147483647, %v1103_v15  ;;  %v1120_v13 = vand.u32 2147483647, %v1104_v29  ;;  %4523 = vst [vmem:[#allocation6_spill] sm:$0xff] %v3646_v17 }
 0x105   : > { %v1121_v7 = vand.u32 2147483647, %v1105_v10  ;;  %4522 = vst [vmem:[#allocation33_spill] sm:$0xff] %v3644_v2  ;;  %v1122_v40 = vand.u32 2147483647, %v1106_v25  ;;  %4524 = vst [vmem:[#allocation7_spill] sm:$0xff] %v3649_v18 }
 0x106   : > { %v1123_v33 = vand.u32 2147483647, %v1107_v12  ;;  %v1128_v32 = vmul.f32 1.442695, %v1112_v35  ;;  %v1124_v48 = vand.u32 2147483647, %v1108_v27 }
 0x107   : > { %v1125_v43 = vand.u32 2147483647, %v1109_v46  ;;  %v1130_v28 = vmul.f32 1.442695, %v1113_v53  ;;  %v1126_v60 = vand.u32 2147483647, %v1110_v63 }
 0x108   : > { %v1127_v51 = vand.u32 2147483647, %v1111_v0  ;;  %v1132_v10 = vmul.f32 1.442695, %v1114_v41  ;;  %v3652_v29 = vld [vmem:[%s2378_s30 + $0x9] sm:$0x1]  ;;  %1988 = vpow2.f32 %v1128_v32 }
 0x109   : > { %v3656_v20 = vadd.f32 %v3652_v29, %v4525_v6  ;;  %v1134_v34 = vmul.f32 1.442695, %v1115_v31  ;;  %v1136_v25 = vmul.f32 1.442695, %v1116_v8  ;;  %v1138_v38 = vmul.f32 1.442695, %v1117_v22 }
 0x10a   : > { %v4526_v23 = vld [vmem:[#allocation23_spill] sm:$0xff]  ;;  %v1140_v54 = vmul.f32 1.442695, %v1118_v59  ;;  %v1142_v39 = vmul.f32 1.442695, %v1119_v3  ;;  %1990 = vpow2.f32 %v1130_v28  ;;  %v4527_v35 = vld [vmem:[#allocation24_spill] sm:$0xff] }
 0x10b   : > { %v3663_v46 = vadd.f32 %v3659_v24, %v4526_v23  ;;  %v3665_v42 = vmul.f32 1.442695, %v1120_v13  ;;  %v3667_v52 = vmul.f32 1.442695, %v1121_v7  ;;  %v3669_v9 = vmul.f32 1.442695, %v1122_v40 }
 0x10c   : > { %v3671_v30 = vmul.f32 1.442695, %v1123_v33  ;;  %1992 = vpow2.f32 %v1132_v10  ;;  %v3673_v36 = vmul.f32 1.442695, %v1124_v48  ;;  %v3675_v45 = vmul.f32 1.442695, %v1125_v43 }
 0x10d   : > { %v3677_v1 = vmul.f32 1.442695, %v1126_v60  ;;  %v3680_v26 = vld [vmem:[%s2378_s30 + $0x4] sm:$0x1]  ;;  %v3683_v16 = vld [vmem:[%s2378_s30 + $0x14] sm:$0x1]  ;;  %1994 = vpow2.f32 %v1134_v34 }
 0x10e   : > { %v3686_v15 = vld [vmem:[%s2378_s30 + $0x24] sm:$0x1]  ;;  %v3688_v12 = vmul.f32 1.442695, %v1127_v51  ;;  %v3691_v27 = vld [vmem:[%s2378_s30 + $0x29] sm:$0x1]  ;;  %1996 = vpow2.f32 %v1136_v25 }
 0x10f   : > { %v3695_v63 = vadd.f32 %v3691_v27, %v4527_v35  ;;  %v3698_v53 = vld [vmem:[%s2378_s30 + $0x39] sm:$0x1]  ;;  %v4528_v41 = vld [vmem:[#allocation25_spill] sm:$0xff]  ;;  %v3705_v0 = vld [vmem:[%s2378_s30 + $0x34] sm:$0x1]  ;;  %1998 = vpow2.f32 %v1138_v38 }
 0x110   : > { %v3702_v31 = vadd.f32 %v3698_v53, %v4528_v41  ;;  %v3708_v8 = vld [vmem:[%s2378_s30 + $0x44] sm:$0x1]  ;;  %v3711_v22 = vld [vmem:[%s2378_s30 + $0x54] sm:$0x1]  ;;  %v3714_v59 = vld [vmem:[%s2378_s30 + $0x49] sm:$0x1]  ;;  %2000 = vpow2.f32 %v1140_v54 }
 0x111   : > { %v4529_v3 = vld [vmem:[#allocation26_spill] sm:$0xff]  ;;  %v3721_v7 = vld [vmem:[%s2378_s30 + $0x59] sm:$0x1]  ;;  %v4530_v40 = vld [vmem:[#allocation27_spill] sm:$0xff]  ;;  %2002 = vpow2.f32 %v1142_v39  ;;  %v1209_v56 = vand.u32 2147483647, %v3683_v16 }
 0x112   : > { %v3718_v13 = vadd.f32 %v3714_v59, %v4529_v3  ;;  %v3725_v33 = vadd.f32 %v3721_v7, %v4530_v40  ;;  %v3728_v32 = vld [vmem:[%s2378_s30 + $0x69] sm:$0x1]  ;;  %v4532_v48 = vld [vmem:[#allocation28_spill] sm:$0xff]  ;;  %v3735_v28 = vld [vmem:[%s2378_s30 + $0x64] sm:$0x1]  ;;  %4543 = vst [vmem:[#allocation27_spill] sm:$0xff] %v3788_v14  ;;  %2004 = vpow2.f32 %v3665_v42 }
 0x113   : > { %4531 = vst [vmem:[#allocation8_spill] sm:$0xff] %v3728_v32  ;;  %v3732_v43 = vadd.f32 %v3728_v32, %v4532_v48  ;;  %v3738_v60 = vld [vmem:[%s2378_s30 + $0x74] sm:$0x1]  ;;  %v3741_v51 = vld [vmem:[%s2378_s30 + $0x84] sm:$0x1]  ;;  %v4536_v23 = vld [vmem:[#allocation31_spill] sm:$0xff]  ;;  %2006 = vpow2.f32 %v3667_v52 }
 0x114   : > { %v3744_v10 = vld [vmem:[%s2378_s30 + $0x79] sm:$0x1]  ;;  %v4534_v6 = vld [vmem:[#allocation30_spill] sm:$0xff]  ;;  %v3765_v40 = vld [vmem:[%s2378_s30 + $0x94] sm:$0x1]  ;;  %4549 = vst [vmem:[#allocation31_spill] sm:$0xff] %v3826_v62  ;;  %2008 = vpow2.f32 %v3669_v9 }
 0x115   : > { %4533 = vst [vmem:[#allocation22_spill] sm:$0xff] %v3744_v10  ;;  %v3748_v34 = vadd.f32 %v3744_v10, %v4534_v6  ;;  %v3751_v25 = vld [vmem:[%s2378_s30 + $0x89] sm:$0x1]  ;;  %v3758_v41 = vld [vmem:[%s2378_s30 + $0x99] sm:$0x1]  ;;  %v4542_v17 = vld [vmem:[#allocation35_spill] sm:$0xff]  ;;  %2010 = vpow2.f32 %v3671_v30 }
 0x116   : > { %4535 = vst [vmem:[#allocation23_spill] sm:$0xff] %v3751_v25  ;;  %v3755_v35 = vadd.f32 %v3751_v25, %v4536_v23  ;;  %4537 = vst [vmem:[#allocation24_spill] sm:$0xff] %v3758_v41  ;;  %v4538_v3 = vld [vmem:[#allocation32_spill] sm:$0xff]  ;;  %v3768_v48 = vld [vmem:[%s2378_s30 + $0xa4] sm:$0x1]  ;;  %2012 = vpow2.f32 %v3673_v36 }
 0x117   : > { %v3762_v38 = vadd.f32 %v3758_v41, %v4538_v3  ;;  %v3771_v6 = vld [vmem:[%s2378_s30 + $0xb4] sm:$0x1]  ;;  %v3774_v18 = vld [vmem:[%s2378_s30 + $0xa9] sm:$0x1]  ;;  %v3781_v44 = vld [vmem:[%s2378_s30 + $0xb9] sm:$0x1]  ;;  %2014 = vpow2.f32 %v3675_v45 }
 0x118   : > { %4539 = vst [vmem:[#allocation25_spill] sm:$0xff] %v3774_v18  ;;  %v4540_v2 = vld [vmem:[#allocation34_spill] sm:$0xff]  ;;  %4541 = vst [vmem:[#allocation26_spill] sm:$0xff] %v3781_v44  ;;  %v3785_v3 = vadd.f32 %v3781_v44, %v4542_v17  ;;  %v4544_v11 = vld [vmem:[#allocation36_spill] sm:$0xff]  ;;  %v1208_v17 = vand.u32 2147483647, %v3680_v26  ;;  %2016 = vpow2.f32 %v3677_v1 }
 0x119   : > { %v3778_v23 = vadd.f32 %v3774_v18, %v4540_v2  ;;  %v3792_v55 = vadd.f32 %v3788_v14, %v4544_v11  ;;  %v3795_v54 = vld [vmem:[%s2378_s30 + $0xc4] sm:$0x1]  ;;  %v3798_v49 = vld [vmem:[%s2378_s30 + $0xd4] sm:$0x1]  ;;  %v1210_v44 = vand.u32 2147483647, %v3686_v15  ;;  %2018 = vpow2.f32 %v3688_v12 }
 0x11a   : > { %v3801_v47 = vld [vmem:[%s2378_s30 + $0xe4] sm:$0x1]  ;;  %v3804_v2 = vld [vmem:[%s2378_s30 + $0xf4] sm:$0x1]  ;;  %v3810_v18 = vld [vmem:[%s2378_s30 + $0xd9] sm:$0x1]  ;;  %v3888_v12 = vadd.f32 %v3659_v24, %v4507_v50  ;;  %v3900_v24 = vadd.f32 %v3691_v27, %v4509_v57 }
 0x11b   : > { %4545 = vst [vmem:[#allocation28_spill] sm:$0xff] %v3810_v18  ;;  %v4546_v11 = vld [vmem:[#allocation37_spill] sm:$0xff]  ;;  %v1211_v41 = vand.u32 2147483647, %v3705_v0  ;;  %v1212_v5 = vand.u32 2147483647, %v3708_v8 }
 0x11c   : > { %v1189_v14 = vadd.f32 %v3810_v18, %v4546_v11  ;;  %v1213_v25 = vand.u32 2147483647, %v3711_v22  ;;  %v3818_v39 = vld [vmem:[%s2378_s30 + $0xe9] sm:$0x1]  ;;  %v1214_v16 = vand.u32 2147483647, %v3735_v28 }
 0x11d   : > { %4547 = vst [vmem:[#allocation30_spill] sm:$0xff] %v3818_v39  ;;  %v4548_v37 = vld [vmem:[#allocation38_spill] sm:$0xff]  ;;  %v1215_v15 = vand.u32 2147483647, %v3738_v60  ;;  %v1216_v10 = vand.u32 2147483647, %v3741_v51 }
 0x11e   : > { %v1190_v26 = vadd.f32 %v3818_v39, %v4548_v37  ;;  %v4550_v11 = vld [vmem:[#allocation39_spill] sm:$0xff]  ;;  %v1217_v8 = vand.u32 2147483647, %v3765_v40  ;;  %v1218_v22 = vand.u32 2147483647, %v3768_v48 }
 0x11f   : > { %v1191_v0 = vadd.f32 %v3826_v62, %v4550_v11  ;;  %v1219_v18 = vand.u32 2147483647, %v3771_v6  ;;  %v1220_v37 = vand.u32 2147483647, %v3795_v54  ;;  %v1221_v28 = vand.u32 2147483647, %v3798_v49  ;;  %v3841_v62 = vpop.eup %1988 }
 0x120   : > { %v1222_v60 = vand.u32 2147483647, %v3801_v47  ;;  %v1223_v51 = vand.u32 2147483647, %v3804_v2  ;;  %v1224_v11 = vand.u32 2147483647, %v3656_v20  ;;  %v3847_v6 = vpop.eup %1990 }
 0x121   : > { %v1225_v40 = vand.u32 2147483647, %v3663_v46  ;;  %4551 = vst [vmem:[#allocation32_spill] sm:$0xff] %v3841_v62  ;;  %v1226_v42 = vand.u32 2147483647, %v3695_v63  ;;  %4552 = vst [vmem:[#allocation34_spill] sm:$0xff] %v3847_v6  ;;  %v3853_v52 = vpop.eup %1992 }
 0x122   : > { %v1227_v48 = vand.u32 2147483647, %v3702_v31  ;;  %v1228_v49 = vand.u32 2147483647, %v3718_v13  ;;  %v1229_v47 = vand.u32 2147483647, %v3725_v33  ;;  %v3859_v13 = vpop.eup %1994 }
 0x123   : > { %v1230_v20 = vand.u32 2147483647, %v3732_v43  ;;  %v1231_v46 = vand.u32 2147483647, %v3748_v34  ;;  %4553 = vst [vmem:[#allocation35_spill] sm:$0xff] %v3853_v52  ;;  %4554 = vst [vmem:[#allocation36_spill] sm:$0xff] %v3859_v13  ;;  %v1240_v43 = vsub.f32 %v1208_v17, %v1224_v11  ;;  %v3863_v2 = vpop.eup %1996  ;;  %v1241_v52 = vsub.f32 %v1209_v56, %v1225_v40 }
 0x124   : > { %v1232_v9 = vand.u32 2147483647, %v3755_v35  ;;  %v1233_v63 = vand.u32 2147483647, %v3762_v38  ;;  %v1234_v31 = vand.u32 2147483647, %v3778_v23  ;;  %v1242_v6 = vsub.f32 %v1210_v44, %v1226_v42  ;;  %v3865_v62 = vpop.eup %1998 }
 0x125   : > { %v1235_v30 = vand.u32 2147483647, %v3785_v3  ;;  %v1236_v33 = vand.u32 2147483647, %v3792_v55  ;;  %v1237_v54 = vand.u32 2147483647, %v1189_v14  ;;  %v1243_v36 = vsub.f32 %v1211_v41, %v1227_v48  ;;  %v3867_v32 = vpop.eup %2000 }
 0x126   : > { %v1238_v34 = vand.u32 2147483647, %v1190_v26  ;;  %v1239_v35 = vand.u32 2147483647, %v1191_v0  ;;  %v1244_v38 = vsub.f32 %v1212_v5, %v1228_v49  ;;  %v1245_v39 = vsub.f32 %v1213_v25, %v1229_v47  ;;  %v3869_v14 = vpop.eup %2002  ;;  %v1336_v57 = vld [vmem:[%s2378_s30 + $0x5] sm:$0x1] }
 0x127   : > { %v1246_v23 = vsub.f32 %v1214_v16, %v1230_v20  ;;  %v1247_v13 = vsub.f32 %v1215_v15, %v1231_v46  ;;  %v1248_v3 = vsub.f32 %v1216_v10, %v1232_v9  ;;  %v1249_v61 = vsub.f32 %v1217_v8, %v1233_v63  ;;  %v1337_v27 = vld [vmem:[%s2378_s30 + $0x15] sm:$0x1] }
 0x128   : > { %v1250_v55 = vsub.f32 %v1218_v22, %v1234_v31  ;;  %v1251_v17 = vsub.f32 %v1219_v18, %v1235_v30  ;;  %v1252_v11 = vsub.f32 %v1220_v37, %v1236_v33  ;;  %v1253_v26 = vsub.f32 %v1221_v28, %v1237_v54  ;;  %v3872_v22 = vpop.eup %2004 }
 0x129   : > { %v1256_v56 = vand.u32 2147483647, %v1240_v43  ;;  %v1254_v44 = vsub.f32 %v1222_v60, %v1238_v34  ;;  %v1257_v41 = vand.u32 2147483647, %v1241_v52  ;;  %v1258_v40 = vand.u32 2147483647, %v1242_v6  ;;  %v3875_v60 = vpop.eup %2006 }
 0x12a   : > { %v1259_v42 = vand.u32 2147483647, %v1243_v36  ;;  %v1255_v0 = vsub.f32 %v1223_v51, %v1239_v35  ;;  %v1260_v5 = vand.u32 2147483647, %v1244_v38  ;;  %v1261_v25 = vand.u32 2147483647, %v1245_v39  ;;  %v3878_v49 = vpop.eup %2008 }
 0x12b   : > { %v1262_v16 = vand.u32 2147483647, %v1246_v23  ;;  %v1263_v15 = vand.u32 2147483647, %v1247_v13  ;;  %v1264_v10 = vand.u32 2147483647, %v1248_v3  ;;  %v3884_v1 = vpop.eup %2010  ;;  %v3904_v34 = vadd.f32 %v3698_v53, %v4510_v58 }
 0x12c   : > { %v1265_v8 = vand.u32 2147483647, %v1249_v61  ;;  %v1266_v18 = vand.u32 2147483647, %v1250_v55  ;;  %v1267_v37 = vand.u32 2147483647, %v1251_v17  ;;  %v3882_v61 = vadd.f32 %v3652_v29, %v4506_v19  ;;  %v3890_v9 = vpop.eup %2012 }
 0x12d   : > { %v1272_v28 = vmul.f32 1.442695, %v1256_v56  ;;  %v1268_v51 = vand.u32 2147483647, %v1252_v11  ;;  %v1269_v48 = vand.u32 2147483647, %v1253_v26  ;;  %v3908_v36 = vadd.f32 %v3714_v59, %v3493_v21 }
 0x12e   : > { %v1274_v39 = vmul.f32 1.442695, %v1257_v41  ;;  %v1270_v45 = vand.u32 2147483647, %v1254_v44  ;;  %v1271_v6 = vand.u32 2147483647, %v1255_v0  ;;  %v3912_v35 = vadd.f32 %v3721_v7, %v3497_v4 }
 0x12f   : > { %v1276_v47 = vmul.f32 1.442695, %v1258_v40  ;;  %v1278_v20 = vmul.f32 1.442695, %v1259_v42  ;;  %v1280_v46 = vmul.f32 1.442695, %v1260_v5  ;;  %2020 = vpow2.f32 %v1272_v28 }
 0x130   : > { %v1282_v52 = vmul.f32 1.442695, %v1261_v25  ;;  %v1284_v63 = vmul.f32 1.442695, %v1262_v16  ;;  %v1286_v31 = vmul.f32 1.442695, %v1263_v15  ;;  %2022 = vpow2.f32 %v1274_v39 }
 0x131   : > { %v1288_v13 = vmul.f32 1.442695, %v1264_v10  ;;  %v1290_v30 = vmul.f32 1.442695, %v1265_v8  ;;  %v1292_v19 = vmul.f32 1.442695, %v1266_v18  ;;  %2024 = vpow2.f32 %v1276_v47 }
 0x132   : > { %v1294_v29 = vmul.f32 1.442695, %v1267_v37  ;;  %v1296_v33 = vmul.f32 1.442695, %v1268_v51  ;;  %v3892_v54 = vmul.f32 1.442695, %v1269_v48  ;;  %2026 = vpow2.f32 %v1278_v20 }
 0x133   : > { %v3894_v43 = vmul.f32 1.442695, %v1270_v45  ;;  %v3896_v50 = vmul.f32 1.442695, %v1271_v6  ;;  %2028 = vpow2.f32 %v1280_v46  ;;  %v4555_v38 = vld [vmem:[#allocation48_spill] sm:$0xff]  ;;  %v4557_v53 = vld [vmem:[#allocation49_spill] sm:$0xff] }
 0x134   : > { %v4556_v23 = vld [vmem:[#allocation8_spill] sm:$0xff]  ;;  %v1338_v58 = vld [vmem:[%s2378_s30 + $0x25] sm:$0x1]  ;;  %2030 = vpow2.f32 %v1282_v52  ;;  %v4560_v59 = vld [vmem:[#allocation23_spill] sm:$0xff]  ;;  %v1352_v52 = vand.u32 2147483647, %v1336_v57 }
 0x135   : > { %v3916_v3 = vadd.f32 %v4556_v23, %v4555_v38  ;;  %v4558_v55 = vld [vmem:[#allocation22_spill] sm:$0xff]  ;;  %v4561_v7 = vld [vmem:[#allocation51_spill] sm:$0xff]  ;;  %v4562_v11 = vld [vmem:[#allocation24_spill] sm:$0xff]  ;;  %2032 = vpow2.f32 %v1284_v63  ;;  %v3973_v63 = vpop.eup %2014 }
 0x136   : > { %v3923_v17 = vadd.f32 %v4558_v55, %v4557_v53  ;;  %v4559_v21 = vld [vmem:[#allocation50_spill] sm:$0xff]  ;;  %v3931_v26 = vadd.f32 %v4562_v11, %v4561_v7  ;;  %v1339_v56 = vld [vmem:[%s2378_s30 + $0x35] sm:$0x1]  ;;  %v4564_v42 = vld [vmem:[#allocation25_spill] sm:$0xff]  ;;  %2034 = vpow2.f32 %v1286_v31  ;;  %v1353_v55 = vand.u32 2147483647, %v1337_v27  ;;  %v3982_v7 = vpop.eup %2016 }
 0x137   : > { %v3927_v4 = vadd.f32 %v4560_v59, %v4559_v21  ;;  %v3935_v44 = vld [vmem:[%s2378_s30 + $0x45] sm:$0x1]  ;;  %v3938_v41 = vld [vmem:[%s2378_s30 + $0x55] sm:$0x1]  ;;  %v4565_v5 = vld [vmem:[#allocation53_spill] sm:$0xff]  ;;  %2036 = vpow2.f32 %v1288_v13 }
 0x138   : > { %v4563_v40 = vld [vmem:[#allocation52_spill] sm:$0xff]  ;;  %v4566_v25 = vld [vmem:[#allocation26_spill] sm:$0xff]  ;;  %v4568_v10 = vld [vmem:[#allocation27_spill] sm:$0xff]  ;;  %v1354_v21 = vand.u32 2147483647, %v1338_v58  ;;  %2038 = vpow2.f32 %v1290_v30 }
 0x139   : > { %v3942_v0 = vadd.f32 %v4564_v42, %v4563_v40  ;;  %v3946_v16 = vadd.f32 %v4566_v25, %v4565_v5  ;;  %v4567_v15 = vld [vmem:[#allocation54_spill] sm:$0xff]  ;;  %v3954_v37 = vld [vmem:[%s2378_s30 + $0x75] sm:$0x1]  ;;  %v4569_v51 = vld [vmem:[#allocation55_spill] sm:$0xff]  ;;  %v1355_v59 = vand.u32 2147483647, %v1339_v56  ;;  %v3989_v5 = vpop.eup %2018  ;;  %2040 = vpow2.f32 %v1292_v19 }
 0x13a   : > { %v3950_v8 = vadd.f32 %v4568_v10, %v4567_v15  ;;  %v1342_v18 = vld [vmem:[%s2378_s30 + $0x65] sm:$0x1]  ;;  %v4570_v48 = vld [vmem:[#allocation28_spill] sm:$0xff]  ;;  %v4574_v23 = vld [vmem:[#allocation31_spill] sm:$0xff]  ;;  %v1356_v57 = vand.u32 2147483647, %v3935_v44  ;;  %2042 = vpow2.f32 %v1294_v29 }
 0x13b   : > { %v3957_v28 = vld [vmem:[%s2378_s30 + $0x85] sm:$0x1]  ;;  %v3961_v39 = vadd.f32 %v4570_v48, %v4569_v51  ;;  %v4571_v45 = vld [vmem:[#allocation56_spill] sm:$0xff]  ;;  %v1357_v40 = vand.u32 2147483647, %v3938_v41  ;;  %2044 = vpow2.f32 %v1296_v33 }
 0x13c   : > { %v4572_v6 = vld [vmem:[#allocation30_spill] sm:$0xff]  ;;  %v3968_v20 = vld [vmem:[%s2378_s30 + $0x95] sm:$0x1]  ;;  %v1358_v42 = vand.u32 2147483647, %v1342_v18  ;;  %v4009_v51 = vpop.eup %2020  ;;  %2046 = vpow2.f32 %v3892_v54 }
 0x13d   : > { %v3965_v47 = vadd.f32 %v4572_v6, %v4571_v45  ;;  %v3971_v46 = vld [vmem:[%s2378_s30 + $0xa5] sm:$0x1]  ;;  %v3980_v53 = vld [vmem:[%s2378_s30 + $0xb5] sm:$0x1]  ;;  %v1368_v27 = vand.u32 2147483647, %v3882_v61  ;;  %2048 = vpow2.f32 %v3894_v43 }
 0x13e   : > { %v4573_v38 = vld [vmem:[#allocation10_spill] sm:$0xff]  ;;  %v3992_v25 = vld [vmem:[%s2378_s30 + $0xd5] sm:$0x1]  ;;  %v1369_v58 = vand.u32 2147483647, %v3888_v12  ;;  %2050 = vpow2.f32 %v3896_v50 }
 0x13f   : > { %v3977_v31 = vadd.f32 %v4574_v23, %v4573_v38  ;;  %v3985_v11 = vld [vmem:[%s2378_s30 + $0xc5] sm:$0x1]  ;;  %v1370_v13 = vand.u32 2147483647, %v3900_v24  ;;  %v4001_v56 = vld [vmem:[%s2378_s30 + $0xf5] sm:$0x1]  ;;  %v1384_v29 = vsub.f32 %v1352_v52, %v1368_v27 }
 0x140   : > { %v3995_v15 = vld [vmem:[%s2378_s30 + $0xe5] sm:$0x1]  ;;  %v1359_v44 = vand.u32 2147483647, %v3954_v37  ;;  %v1360_v41 = vand.u32 2147483647, %v3957_v28  ;;  %v4014_v37 = vpop.eup %2022  ;;  %v1385_v28 = vsub.f32 %v1353_v55, %v1369_v58 }
 0x141   : > { %v1371_v10 = vand.u32 2147483647, %v3904_v34  ;;  %v1361_v30 = vand.u32 2147483647, %v3968_v20  ;;  %v1362_v18 = vand.u32 2147483647, %v3971_v46  ;;  %v1386_v48 = vsub.f32 %v1354_v21, %v1370_v13  ;;  %v4017_v45 = vpop.eup %2024 }
 0x142   : > { %v1372_v61 = vand.u32 2147483647, %v3908_v36  ;;  %v1363_v12 = vand.u32 2147483647, %v3980_v53  ;;  %v1373_v19 = vand.u32 2147483647, %v3912_v35  ;;  %v4022_v46 = vpop.eup %2026 }
 0x143   : > { %v1374_v24 = vand.u32 2147483647, %v3916_v3  ;;  %v1364_v34 = vand.u32 2147483647, %v3985_v11  ;;  %v1365_v36 = vand.u32 2147483647, %v3992_v25  ;;  %v1387_v20 = vsub.f32 %v1355_v59, %v1371_v10  ;;  %v4027_v38 = vpop.eup %2028 }
 0x144   : > { %v1366_v6 = vand.u32 2147483647, %v3995_v15  ;;  %v1375_v33 = vand.u32 2147483647, %v3923_v17  ;;  %v1367_v35 = vand.u32 2147483647, %v4001_v56  ;;  %v1388_v52 = vsub.f32 %v1356_v57, %v1372_v61  ;;  %v4031_v11 = vpop.eup %2030 }
 0x145   : > { %v1376_v3 = vand.u32 2147483647, %v3927_v4  ;;  %v1377_v23 = vand.u32 2147483647, %v3931_v26  ;;  %v1378_v53 = vand.u32 2147483647, %v3942_v0  ;;  %v1389_v55 = vsub.f32 %v1357_v40, %v1373_v19  ;;  %v4034_v25 = vpop.eup %2032 }
 0x146   : > { %v1390_v21 = vsub.f32 %v1358_v42, %v1374_v24  ;;  %v1400_v17 = vand.u32 2147483647, %v1384_v29  ;;  %v1401_v59 = vand.u32 2147483647, %v1385_v28  ;;  %v1402_v54 = vand.u32 2147483647, %v1386_v48  ;;  %v4038_v26 = vpop.eup %2034 }
 0x147   : > { %v1379_v4 = vand.u32 2147483647, %v3946_v16  ;;  %v1391_v57 = vsub.f32 %v1359_v44, %v1375_v33  ;;  %v1403_v15 = vand.u32 2147483647, %v1387_v20  ;;  %v1380_v0 = vand.u32 2147483647, %v3950_v8  ;;  %v4043_v10 = vpop.eup %2036 }
 0x148   : > { %v1381_v40 = vand.u32 2147483647, %v3961_v39  ;;  %v1392_v42 = vsub.f32 %v1360_v41, %v1376_v3  ;;  %v1404_v27 = vand.u32 2147483647, %v1388_v52  ;;  %v1382_v43 = vand.u32 2147483647, %v3965_v47  ;;  %v4045_v19 = vpop.eup %2038 }
 0x149   : > { %v1393_v58 = vsub.f32 %v1361_v30, %v1377_v23  ;;  %v1405_v13 = vand.u32 2147483647, %v1389_v55  ;;  %v1406_v56 = vand.u32 2147483647, %v1390_v21  ;;  %v1394_v50 = vsub.f32 %v1362_v18, %v1378_v53  ;;  %v4048_v41 = vpop.eup %2040  ;;  %v4576_v21 = vld [vmem:[#allocation18_spill] sm:$0xff] }
 0x14a   : > { %v1416_v61 = vmul.f32 1.442695, %v1400_v17  ;;  %v1418_v16 = vmul.f32 1.442695, %v1401_v59  ;;  %v1420_v44 = vmul.f32 1.442695, %v1402_v54  ;;  %v1395_v8 = vsub.f32 %v1363_v12, %v1379_v4  ;;  %v4050_v48 = vpop.eup %2042 }
 0x14b   : > { %v1383_v24 = vand.u32 2147483647, %v3977_v31  ;;  %v1407_v29 = vand.u32 2147483647, %v1391_v57  ;;  %v1422_v39 = vmul.f32 1.442695, %v1403_v15  ;;  %v1396_v28 = vsub.f32 %v1364_v34, %v1380_v0  ;;  %v4052_v3 = vpop.eup %2044 }
 0x14c   : > { %v1408_v47 = vand.u32 2147483647, %v1392_v42  ;;  %2052 = vpow2.f32 %v1416_v61  ;;  %v1424_v30 = vmul.f32 1.442695, %v1404_v27  ;;  %v1397_v33 = vsub.f32 %v1365_v36, %v1381_v40  ;;  %v4575_v34 = vld [vmem:[#allocation9_spill] sm:$0xff]  ;;  %v4056_v36 = vpop.eup %2046  ;;  %v4578_v57 = vld [vmem:[#allocation19_spill] sm:$0xff] }
 0x14d   : > { %v1409_v18 = vand.u32 2147483647, %v1393_v58  ;;  %2054 = vpow2.f32 %v1418_v16  ;;  %v1426_v20 = vmul.f32 1.442695, %v1405_v13  ;;  %v1398_v52 = vsub.f32 %v1366_v6, %v1382_v43  ;;  %v4577_v4 = vld [vmem:[#allocation41_spill] sm:$0xff]  ;;  %v4579_v40 = vld [vmem:[#allocation11_spill] sm:$0xff]  ;;  %v4062_v58 = vpop.eup %2048 }
 0x14e   : > { %v1410_v23 = vand.u32 2147483647, %v1394_v50  ;;  %2056 = vpow2.f32 %v1420_v44  ;;  %v1428_v31 = vmul.f32 1.442695, %v1406_v56  ;;  %v1399_v12 = vsub.f32 %v1367_v35, %v1383_v24  ;;  %v4580_v42 = vld [vmem:[#allocation32_spill] sm:$0xff]  ;;  %v4582_v56 = vld [vmem:[#allocation34_spill] sm:$0xff]  ;;  %v4066_v44 = vpop.eup %2050 }
 0x14f   : > { %v1411_v53 = vand.u32 2147483647, %v1395_v8  ;;  %2058 = vpow2.f32 %v1422_v39  ;;  %v1430_v55 = vmul.f32 1.442695, %v1407_v29  ;;  %v1026_v17 = vadd.f32 %v4576_v21, %v4575_v34  ;;  %v4581_v13 = vld [vmem:[#allocation12_spill] sm:$0xff]  ;;  %v4583_v24 = vld [vmem:[#allocation42_spill] sm:$0xff] }
 0x150   : > { %v1412_v59 = vand.u32 2147483647, %v1396_v28  ;;  %2060 = vpow2.f32 %v1424_v30  ;;  %v1432_v54 = vmul.f32 1.442695, %v1408_v47  ;;  %v1027_v15 = vadd.f32 %v4578_v57, %v4577_v4  ;;  %v4584_v8 = vld [vmem:[#allocation20_spill] sm:$0xff]  ;;  %v4585_v39 = vld [vmem:[#allocation13_spill] sm:$0xff] }
 0x151   : > { %v1413_v0 = vand.u32 2147483647, %v1397_v33  ;;  %2062 = vpow2.f32 %v1426_v20  ;;  %v1434_v6 = vmul.f32 1.442695, %v1409_v18  ;;  %v1160_v35 = vadd.f32 %v4580_v42, %v4579_v40  ;;  %v4586_v28 = vld [vmem:[#allocation35_spill] sm:$0xff]  ;;  %v4587_v33 = vld [vmem:[#allocation44_spill] sm:$0xff] }
 0x152   : > { %v1414_v27 = vand.u32 2147483647, %v1398_v52  ;;  %2064 = vpow2.f32 %v1428_v31  ;;  %v1436_v43 = vmul.f32 1.442695, %v1410_v23  ;;  %v1161_v50 = vadd.f32 %v4582_v56, %v4581_v13  ;;  %v4588_v18 = vld [vmem:[#allocation78_spill] sm:$0xff]  ;;  %v4590_v23 = vld [vmem:[#allocation36_spill] sm:$0xff] }
 0x153   : > { %v1415_v61 = vand.u32 2147483647, %v1399_v12  ;;  %2066 = vpow2.f32 %v1430_v55  ;;  %v1438_v16 = vmul.f32 1.442695, %v1411_v53  ;;  %v1028_v29 = vadd.f32 %v4584_v8, %v4583_v24  ;;  %v4589_v52 = vld [vmem:[#allocation14_spill] sm:$0xff]  ;;  %v4591_v55 = vld [vmem:[#allocation15_spill] sm:$0xff] }
 0x154   : > { %v1162_v47 = vadd.f32 %v4586_v28, %v4585_v39  ;;  %2068 = vpow2.f32 %v1432_v54  ;;  %v1440_v30 = vmul.f32 1.442695, %v1412_v59  ;;  %v1029_v20 = vadd.f32 %v4588_v18, %v4587_v33  ;;  %v4592_v4 = vld [vmem:[#allocation16_spill] sm:$0xff]  ;;  %v4593_v40 = vld [vmem:[#allocation45_spill] sm:$0xff]  ;;  %v4600_v8 = vld [vmem:[#allocation7_spill] sm:$0xff] }
 0x155   : > { %v1163_v31 = vadd.f32 %v4590_v23, %v4589_v52  ;;  %2070 = vpow2.f32 %v1434_v6  ;;  %v1442_v12 = vmul.f32 1.442695, %v1413_v0  ;;  %v1164_v53 = vadd.f32 %v3863_v2, %v4591_v55  ;;  %v4594_v42 = vld [vmem:[#allocation29_spill] sm:$0xff] }
 0x156   : > { %v1304_v34 = vadd.f32 %v4009_v51, %v1160_v35  ;;  %2072 = vpow2.f32 %v1436_v43  ;;  %v1444_v21 = vmul.f32 1.442695, %v1414_v27  ;;  %v1165_v57 = vadd.f32 %v3865_v62, %v4592_v4  ;;  %v4595_v56 = vld [vmem:[#allocation17_spill] sm:$0xff]  ;;  %v4596_v51 = vld [vmem:[#allocation47_spill] sm:$0xff]  ;;  %v4597_v35 = vld [vmem:[#allocation6_spill] sm:$0xff] }
 0x157   : > { %v1305_v59 = vadd.f32 %v4014_v37, %v1161_v50  ;;  %2074 = vpow2.f32 %v1438_v16  ;;  %v1446_v54 = vmul.f32 1.442695, %v1415_v61  ;;  %v1030_v13 = vadd.f32 %v4594_v42, %v4593_v40  ;;  %v4598_v43 = vld [vmem:[#allocation21_spill] sm:$0xff]  ;;  %v4605_v40 = vld [vmem:[#allocation58_spill] sm:$0xff] }
 0x158   : > { %v1166_v0 = vadd.f32 %v3867_v32, %v4595_v56  ;;  %v1306_v6 = vadd.f32 %v4017_v45, %v1162_v47  ;;  %2076 = vpow2.f32 %v1440_v30  ;;  %v1031_v27 = vadd.f32 %v4597_v35, %v4596_v51  ;;  %v4599_v61 = vld [vmem:[#allocation33_spill] sm:$0xff] }
 0x159   : > { %v2053_v2 = vpop.eup %2052  ;;  %v1167_v62 = vadd.f32 %v3869_v14, %v4598_v43  ;;  %v1307_v37 = vadd.f32 %v4022_v46, %v1163_v31  ;;  %2078 = vpow2.f32 %v1442_v12  ;;  %v1168_v16 = vadd.f32 %v3872_v22, %v4599_v61 }
 0x15a   : > { %v2055_v50 = vpop.eup %2054  ;;  %v1308_v24 = vadd.f32 %v4027_v38, %v1164_v53  ;;  %2080 = vpow2.f32 %v1444_v21  ;;  %v1448_v32 = vadd.f32 %v2053_v2, %v1304_v34  ;;  %v1169_v39 = vadd.f32 %v3875_v60, %v4600_v8  ;;  %v4614_v8 = vld [vmem:[#allocation75_spill] sm:$0xff] }
 0x15b   : > { %v2057_v45 = vpop.eup %2056  ;;  %v1309_v28 = vadd.f32 %v4031_v11, %v1165_v57  ;;  %2082 = vpow2.f32 %v1446_v54  ;;  %v1449_v47 = vadd.f32 %v2055_v50, %v1305_v59  ;;  %v1170_v46 = vadd.f32 %v3878_v49, %v1026_v17  ;;  %v4603_v57 = vld [vmem:[#allocation62_spill] sm:$0xff] }
 0x15c   : > { %v2059_v14 = vpop.eup %2058  ;;  %v1310_v30 = vadd.f32 %v4034_v25, %v1166_v0  ;;  %v1450_v33 = vadd.f32 %v2057_v45, %v1306_v6  ;;  %2084 = vlog2.f32 %v1448_v32  ;;  %v1171_v38 = vadd.f32 %v3884_v1, %v1027_v15  ;;  %v4613_v45 = vld [vmem:[#allocation69_spill] sm:$0xff] }
 0x15d   : > { %v2061_v22 = vpop.eup %2060  ;;  %v1311_v18 = vadd.f32 %v4038_v26, %v1167_v62  ;;  %v1451_v52 = vadd.f32 %v2059_v14, %v1307_v37  ;;  %2086 = vlog2.f32 %v1449_v47  ;;  %v1172_v60 = vadd.f32 %v3890_v9, %v1028_v29  ;;  %v4609_v62 = vld [vmem:[#allocation67_spill] sm:$0xff]  ;;  %v4610_v37 = vld [vmem:[#allocation46_spill] sm:$0xff]  ;;  %v4616_v14 = vld [vmem:[#allocation76_spill] sm:$0xff] }
 0x15e   : > { %v2063_v23 = vpop.eup %2062  ;;  %v1312_v11 = vadd.f32 %v4043_v10, %v1168_v16  ;;  %v1452_v31 = vadd.f32 %v2061_v22, %v1308_v24  ;;  %2088 = vlog2.f32 %v1450_v33  ;;  %v1173_v49 = vadd.f32 %v3973_v63, %v1029_v20  ;;  %v4601_v63 = vld [vmem:[#allocation64_spill] sm:$0xff]  ;;  %v4602_v20 = vld [vmem:[#allocation57_spill] sm:$0xff]  ;;  %v4615_v47 = vld [vmem:[#allocation70_spill] sm:$0xff] }
 0x15f   : > { %v2065_v12 = vpop.eup %2064  ;;  %v1313_v25 = vadd.f32 %v4045_v19, %v1169_v39  ;;  %v1453_v17 = vadd.f32 %v2063_v23, %v1309_v28  ;;  %2090 = vlog2.f32 %v1451_v52  ;;  %v1174_v1 = vadd.f32 %v3982_v7, %v1030_v13  ;;  %v4611_v16 = vld [vmem:[#allocation68_spill] sm:$0xff]  ;;  %v4618_v33 = vld [vmem:[#allocation77_spill] sm:$0xff] }
 0x160   : > { %v2067_v55 = vpop.eup %2066  ;;  %v1314_v26 = vadd.f32 %v4048_v41, %v1170_v46  ;;  %v1454_v15 = vadd.f32 %v2065_v12, %v1310_v30  ;;  %2092 = vlog2.f32 %v1452_v31  ;;  %v1175_v9 = vadd.f32 %v3989_v5, %v1031_v27  ;;  %v4608_v27 = vld [vmem:[#allocation61_spill] sm:$0xff]  ;;  %v4612_v24 = vld [vmem:[#allocation72_spill] sm:$0xff]  ;;  %v4617_v30 = vld [vmem:[#allocation71_spill] sm:$0xff] }
 0x161   : > { %v2069_v53 = vpop.eup %2068  ;;  %v1315_v10 = vadd.f32 %v4050_v48, %v1171_v38  ;;  %v1455_v29 = vadd.f32 %v2067_v55, %v1311_v18  ;;  %2094 = vlog2.f32 %v1453_v17  ;;  %v592_v19 = vadd.f32 %v4602_v20, %v4601_v63  ;;  %v4604_v48 = vld [vmem:[#allocation65_spill] sm:$0xff] }
 0x162   : > { %v2071_v34 = vpop.eup %2070  ;;  %v1316_v21 = vadd.f32 %v4052_v3, %v1172_v60  ;;  %v1456_v4 = vadd.f32 %v2069_v53, %v1312_v11  ;;  %2096 = vlog2.f32 %v1454_v15  ;;  %v4114_v41 = vmul.f32 0.25, %v4603_v57  ;;  %v4606_v3 = vld [vmem:[#allocation73_spill] sm:$0xff] }
 0x163   : > { %v2073_v7 = vpop.eup %2072  ;;  %v1317_v59 = vadd.f32 %v4056_v36, %v1173_v49  ;;  %v1457_v54 = vadd.f32 %v2071_v34, %v1313_v25  ;;  %2098 = vlog2.f32 %v1455_v29  ;;  %v593_v42 = vadd.f32 %v4605_v40, %v4604_v48  ;;  %v4607_v36 = vld [vmem:[#allocation66_spill] sm:$0xff] }
 0x164   : > { %v2075_v5 = vpop.eup %2074  ;;  %v1318_v13 = vadd.f32 %v4062_v58, %v1174_v1  ;;  %v1458_v56 = vadd.f32 %v2073_v7, %v1314_v26  ;;  %2100 = vlog2.f32 %v1456_v4  ;;  %v4121_v6 = vmul.f32 0.25, %v4606_v3 }
 0x165   : > { %v2077_v0 = vpop.eup %2076  ;;  %v1319_v2 = vadd.f32 %v4066_v44, %v1175_v9  ;;  %v1459_v51 = vadd.f32 %v2075_v5, %v1315_v10  ;;  %2102 = vlog2.f32 %v1457_v54  ;;  %v594_v43 = vadd.f32 %v4608_v27, %v4607_v36  ;;  %v4620_v5 = vld [vmem:[#allocation59_spill] sm:$0xff] }
 0x166   : > { %v2079_v35 = vpop.eup %2078  ;;  %v595_v50 = vadd.f32 %v4610_v37, %v4609_v62  ;;  %v1460_v61 = vadd.f32 %v2077_v0, %v1316_v21  ;;  %2104 = vlog2.f32 %v1458_v56  ;;  %v596_v32 = vadd.f32 %v4612_v24, %v4611_v16  ;;  %v4621_v56 = vld [vmem:[#allocation60_spill] sm:$0xff] }
 0x167   : > { %v2081_v58 = vpop.eup %2080  ;;  %v597_v39 = vadd.f32 %v4614_v8, %v4613_v45  ;;  %v1461_v28 = vadd.f32 %v2079_v35, %v1317_v59  ;;  %2106 = vlog2.f32 %v1459_v51  ;;  %v598_v46 = vadd.f32 %v4616_v14, %v4615_v47  ;;  %v4619_v59 = vld [vmem:[#allocation40_spill] sm:$0xff]  ;;  %v4622_v35 = vld [vmem:[#allocation43_spill] sm:$0xff]  ;;  %v4624_v45 = vld [vmem:[#allocation74_spill] sm:$0xff] }
 0x168   : > { %v2083_v44 = vpop.eup %2082  ;;  %v599_v22 = vadd.f32 %v4618_v33, %v4617_v30  ;;  %v1462_v38 = vadd.f32 %v2081_v58, %v1318_v13  ;;  %2108 = vlog2.f32 %v1460_v61  ;;  %v4136_v52 = vmul.f32 0.25, %v592_v19 }
 0x169   : > { %v2085_v18 = vpop.eup %2084  ;;  %v4138_v23 = vmul.f32 0.25, %v593_v42  ;;  %v1463_v60 = vadd.f32 %v2083_v44, %v1319_v2  ;;  %2110 = vlog2.f32 %v1461_v28  ;;  %v4140_v31 = vmul.f32 0.25, %v594_v43 }
 0x16a   : > { %v2087_v11 = vpop.eup %2086  ;;  %v4142_v12 = vmul.f32 0.25, %v595_v50  ;;  %v1465_v49 = vmul.f32 0.6931472, %v2085_v18  ;;  %2112 = vlog2.f32 %v1462_v38  ;;  %v4144_v17 = vmul.f32 0.25, %v596_v32  ;;  %v4623_v50 = vld [vmem:[#allocation63_spill] sm:$0xff] }
 0x16b   : > { %v2089_v25 = vpop.eup %2088  ;;  %v4146_v55 = vmul.f32 0.25, %v597_v39  ;;  %v1467_v1 = vmul.f32 0.6931472, %v2087_v11  ;;  %2114 = vlog2.f32 %v1463_v60  ;;  %v4148_v15 = vmul.f32 0.25, %v598_v46 }
 0x16c   : > { %v2091_v26 = vpop.eup %2090  ;;  %v4150_v53 = vmul.f32 0.25, %v599_v22  ;;  %v1469_v9 = vmul.f32 0.6931472, %v2089_v25  ;;  %v1689_v10 = vadd.f32 -1.7917595, %v1465_v49 }
 0x16d   : > { %v2093_v29 = vpop.eup %2092  ;;  %v1471_v34 = vmul.f32 0.6931472, %v2091_v26  ;;  %v1690_v63 = vadd.f32 -1.7917595, %v1467_v1 }
 0x16e   : > { %v2095_v20 = vpop.eup %2094  ;;  %v1473_v19 = vmul.f32 0.6931472, %v2093_v29  ;;  %v1691_v21 = vadd.f32 -1.7917595, %v1469_v9  ;;  %v1512_v54 = vadd.f32 %v1689_v10, %v4619_v59 }
 0x16f   : > { %v2097_v4 = vpop.eup %2096  ;;  %v1475_v7 = vmul.f32 0.6931472, %v2095_v20  ;;  %v1692_v57 = vadd.f32 -1.7917595, %v1471_v34  ;;  %v1513_v48 = vadd.f32 %v1690_v63, %v4620_v5 }
 0x170   : > { %v2099_v40 = vpop.eup %2098  ;;  %v1477_v42 = vmul.f32 0.6931472, %v2097_v4  ;;  %v1693_v13 = vadd.f32 -1.7917595, %v1473_v19  ;;  %v1514_v0 = vadd.f32 %v1691_v21, %v4621_v56 }
 0x171   : > { %v2101_v3 = vpop.eup %2100  ;;  %v1479_v2 = vmul.f32 0.6931472, %v2099_v40  ;;  %v1694_v51 = vadd.f32 -1.7917595, %v1475_v7  ;;  %v1515_v36 = vadd.f32 %v1692_v57, %v4622_v35  ;;  %v1545_v27 = vrot.slane %v1513_v48, 7 }
 0x172   : > { %v2103_v43 = vpop.eup %2102  ;;  %v1481_v62 = vmul.f32 0.6931472, %v2101_v3  ;;  %v1695_v37 = vadd.f32 -1.7917595, %v1477_v42  ;;  %v1516_v61 = vadd.f32 %v1693_v13, %v4623_v50  ;;  %v1548_v58 = vrot.slane %v1514_v0, 6 }
 0x173   : > { %v2105_v16 = vpop.eup %2104  ;;  %v1483_v24 = vmul.f32 0.6931472, %v2103_v43  ;;  %v1696_v32 = vadd.f32 -1.7917595, %v1479_v2  ;;  %v1517_v8 = vadd.f32 %v1694_v51, %v4624_v45  ;;  %v1547_v39 = vsel %vm1546_vm0, %v1545_v27, %v1512_v54 }
 0x174   : > { %v2107_v28 = vpop.eup %2106  ;;  %v1485_v44 = vmul.f32 0.6931472, %v2105_v16  ;;  %v1697_v47 = vadd.f32 -1.7917595, %v1481_v62  ;;  %v1518_v14 = vadd.f32 %v1695_v37, %v4114_v41  ;;  %v1550_v46 = vsel %vm1549_vm1, %v1548_v58, %v1547_v39 }
 0x175   : > { %v2109_v30 = vpop.eup %2108  ;;  %v1487_v33 = vmul.f32 0.6931472, %v2107_v28  ;;  %v1698_v22 = vadd.f32 -1.7917595, %v1483_v24  ;;  %v1519_v38 = vadd.f32 %v1696_v32, %v4121_v6  ;;  %v1551_v18 = vrot.slane %v1515_v36, 5 }
 0x176   : > { %v2111_v60 = vpop.eup %2110  ;;  %v1489_v11 = vmul.f32 0.6931472, %v2109_v30  ;;  %v1699_v49 = vadd.f32 -1.7917595, %v1485_v44  ;;  %v1520_v25 = vadd.f32 %v1697_v47, %v4136_v52  ;;  %v1554_v1 = vrot.slane %v1516_v61, 4 }
 0x177   : > { %v2113_v26 = vpop.eup %2112  ;;  %v1491_v9 = vmul.f32 0.6931472, %v2111_v60  ;;  %v1700_v10 = vadd.f32 -1.7917595, %v1487_v33  ;;  %v1521_v29 = vadd.f32 %v1698_v22, %v4138_v23  ;;  %v1553_v41 = vsel %vm1552_vm2, %v1551_v18, %v1550_v46  ;;  %v1528_v32 = vld [vmem:[%s2374_s28] sm:$0x1] }
 0x178   : > { %v2115_v34 = vpop.eup %2114  ;;  %v1493_v63 = vmul.f32 0.6931472, %v2113_v26  ;;  %v1701_v20 = vadd.f32 -1.7917595, %v1489_v11  ;;  %v1522_v19 = vadd.f32 %v1699_v49, %v4140_v31  ;;  %v1556_v6 = vsel %vm1555_vm3, %v1554_v1, %v1553_v41 }
 0x179   : > { %v1495_v21 = vmul.f32 0.6931472, %v2115_v34  ;;  %v1702_v4 = vadd.f32 -1.7917595, %v1491_v9  ;;  %v1523_v7 = vadd.f32 %v1700_v10, %v4142_v12  ;;  %v1557_v52 = vrot.slane %v1517_v8, 3 }
 0x17a   : > { %v1703_v57 = vadd.f32 -1.7917595, %v1493_v63  ;;  %v1524_v59 = vadd.f32 %v1701_v20, %v4144_v17  ;;  %v1560_v54 = vrot.slane %v1518_v14, 2  ;;  %v1566_v40 = vrot.slane %v1521_v29, 7 }
 0x17b   : > { %v1704_v23 = vadd.f32 -1.7917595, %v1495_v21  ;;  %v1525_v5 = vadd.f32 %v1702_v4, %v4146_v55  ;;  %v1559_v48 = vsel %vm1558_vm4, %v1557_v52, %v1556_v6  ;;  %v1568_v42 = vrot.slane %v1522_v19, 6 }
 0x17c   : > { %v1526_v31 = vadd.f32 %v1703_v57, %v4148_v15  ;;  %v1570_v13 = vrot.slane %v1523_v7, 5  ;;  %v1563_v12 = vrot.slane %v1519_v38, 1  ;;  %v1567_v0 = vsel %vm1546_vm0, %v1566_v40, %v1520_v25 }
 0x17d   : > { %v1527_v56 = vadd.f32 %v1704_v23, %v4150_v53  ;;  %v1572_v3 = vrot.slane %v1524_v59, 4  ;;  %v1562_v17 = vsel %vm1561_vm5, %v1560_v54, %v1559_v48  ;;  %v1569_v2 = vsel %vm1549_vm1, %v1568_v42, %v1567_v0 }
 0x17e   : > { %v1574_v55 = vrot.slane %v1525_v5, 3  ;;  %v1576_v51 = vrot.slane %v1526_v31, 2  ;;  %v1571_v35 = vsel %vm1552_vm2, %v1570_v13, %v1569_v2  ;;  %v1565_v53 = vsel %vm1564_vm6, %v1563_v12, %v1562_v17 }
 0x17f   : > { %v1578_v15 = vrot.slane %v1527_v56, 1  ;;  %v1573_v36 = vsel %vm1555_vm3, %v1572_v3, %v1571_v35 }
 0x180   : > { %v1575_v27 = vsel %vm1558_vm4, %v1574_v55, %v1573_v36 }
 0x181   : > { %v1577_v43 = vsel %vm1561_vm5, %v1576_v51, %v1575_v27 }
 0x182   : > { %v1579_v62 = vsel %vm1564_vm6, %v1578_v15, %v1577_v43 }
 0x183   : > { %v1582_v37 = vadd.f32 %v1579_v62, %v1565_v53 }
 0x185   : > { %v1583_v50 = vrot.slane %v1582_v37, 4 }
 0x187   : > { %v1584_v61 = vadd.f32 %v1583_v50, %v1582_v37 }
 0x189   : > { %v1585_v58 = vrot.slane %v1584_v61, 2 }
 0x18b   : > { %v1586_v16 = vadd.f32 %v1585_v58, %v1584_v61 }
 0x18d   : > { %v1587_v24 = vrot.slane %v1586_v16, 1 }
 0x18f   : > { %v1588_v45 = vadd.f32 %v1587_v24, %v1586_v16 }
 0x191   : > { %v1589_v8 = vadd.f32 %v1588_v45, %v1528_v32 }
 0x193   : > { %1590 = vst [vmem:[%s2374_s28] sm:$0x1] %v1589_v8 }
 0x19a   : > { %v1594_v39 = vld [vmem:[%s2374_s28] sm:$0x1] }
 0x19b   : > { %v1595_v28 = vmul.f32 0.0625, %v1594_v39 }
 0x19d   : > { %1596 = vst [vmem:[%s2374_s28] sm:$0x1] %v1595_v28 }
 0x19e   : > { %2161 = shalt.err (!%p2158_p7)
}
 0x19f   : > { %s2162_s9 = scalar_lea.hbm %s1608_s12, 16  ;;  %s2166_s24 = scalar_lea.hbm %s4228_s1, 32 }
 0x1a0   : > { %p2163_p8 = scmp.ne.s32.totalorder %s1608_s12, %s2162_s9  ;;  %p2167_p13 = scmp.lt.s32.totalorder %s1608_s12, %s4228_s1 }
 0x1a1   : > { %p2168_p0 = scmp.lt.s32.totalorder %s2166_s24, %s2162_s9 }
 0x1a2   : > { %p2164_p11 = pnand %p2163_p8, %p2277_p5 }
 0x1a3   : > { %p2169_p1 = por %p2168_p0, %p2167_p13 }
 0x1a4   : > { %p2165_p12 = pneg %p2164_p11 }
 0x1a6   : > { %p2170_p10 = pnand %p2169_p1, %p2165_p12 }
 0x1a8   : > { %2173 = shalt.err (!%p2170_p10)
}
 0x1a9   : > { %1708 = dma.vmem_to_hbm [thread:$0]  (%p2277_p5), %s1611_s3, 16, %s1608_s12, %s1598_s13  }
 0x1aa PF: > { %s1622_s27 = sand.u32 1, %s2204_s6   ;;  %p4625_p2 = scmp.ge.s32.totalorder %s2224_s11, 2 }
 0x1ab   : > { %s1623_s28 = scalar_lea.sflag [#allocation4], %s1622_s27 }
 0x1ac   : > { %p1711_p3 = pnand %p4625_p2, %p2288_p9 }
 0x1ae   : > { %p1712_p4 = pneg %p1711_p3 }
 0x1b0   : > { %2199 = dma.done.wait (%p1712_p4), %s1623_s28, 16  }
 0x1b1   : > { %2201 = vsyncadd (%p1712_p4), %s1623_s28, 4294967280  ;;  %s14_s11 = sadd.s32 1, %s2224_s11   ;;  %s4626_s6 = smov %s2208_s7 }
 0x1b2   : > { %p11_p6 = scmp.ge.s32.totalorder %s14_s11, 4   ;;  %s4627_s7 = smov %s2212_s8 }
 0x1b3   : > { %s4628_s8 = smov %s2286_s18  ;;  %s4629_s9 = smov %s2220_s10 }
 0x1b4   : > { %s4630_s10 = smov %s4632_s14  ;;  %13 = sbr.rel (!%p11_p6) target bundleno = 4 (0x4), region = 110 }
 0x1b9   :  { %1627 = vsyncpa [#allocation4], 1 }
 0x1ba   :  { %1629 = vsyncpa [#allocation4 + $0x1], 1 }

</bundles_post_ra>
